<compile_context>
chip_gen: v5e
topology: v5e:2x2
jax: 0.10.0
libtpu: 0.0.40
codegen_flags: <defaults>
</compile_context>

<pallas_src>
import functools

import jax
import jax.numpy as jnp
from jax.experimental import pallas as pl
from jax.experimental.pallas import tpu as pltpu

INPUT_DIM = 128
HIDDEN = (1024, 512, 64)
OUT_DIM = 1
LANE = 128


def _round_up(n, m):
    return ((n + m - 1) // m) * m


# --------------------------------------------------------------------------
# Kernel: one batch tile through the whole MLP.
# --------------------------------------------------------------------------
def adversary_kernel(x_ref,
                     w1_ref, b1_ref,
                     w2_ref, b2_ref,
                     w3_ref, b3_ref,
                     w4_ref, b4_ref,
                     o_ref):
    # In-kernel f32 -> bf16 cast of the activation tile (VPU, hidden under MXU).
    x = x_ref[...].astype(jnp.bfloat16)

    # Layer 1: Linear(128 -> 1024) + ReLU   (bf16 MXU inputs, f32 accumulate)
    h = jnp.dot(x, w1_ref[...], preferred_element_type=jnp.float32)
    h = jnp.maximum(h + b1_ref[...], 0.0)

    # Layer 2: Linear(1024 -> 512) + ReLU
    h = jnp.dot(h.astype(jnp.bfloat16), w2_ref[...],
                preferred_element_type=jnp.float32)
    h = jnp.maximum(h + b2_ref[...], 0.0)

    # Layer 3: Linear(512 -> 64) + ReLU, zero-padded to 128 output lanes so the
    # result is a full lane-dense vreg (lanes 64..127 are exactly 0).
    h = jnp.dot(h.astype(jnp.bfloat16), w3_ref[...],
                preferred_element_type=jnp.float32)
    h = jnp.maximum(h + b3_ref[...], 0.0)

    # Layer 4: Linear(64 -> 1) as a VPU multiply + lane reduce (no N=1 matmul).
    # w4_ref is (1, 128) f32 (last 64 lanes zero), b4_ref is (1, 1) f32 in SMEM.
    logits = jnp.sum(h * w4_ref[...], axis=-1, keepdims=True) + b4_ref[0, 0]
    o_ref[...] = jax.nn.sigmoid(logits)


# --------------------------------------------------------------------------
# Wrapper
# --------------------------------------------------------------------------
def _choose_tiling(B, batch_tile):
    """Pick (tile_rows, num_tiles): big MXU-friendly tiles, >= 2 tiles whenever
    the batch is big enough (so both v7x TensorCores get work), and at most a
    few sublane-padding rows in the last tile."""
    num_tiles = pl.cdiv(B, batch_tile)
    if num_tiles == 1 and B > 16:
        num_tiles = 2
    bt = _round_up(pl.cdiv(B, num_tiles), 8)
    num_tiles = pl.cdiv(B, bt)
    return bt, num_tiles


@functools.partial(jax.jit, static_argnames=("batch_tile",))
def adversary_forward(x, kparams, *, batch_tile=1024):
    """x: (B, 128) float32. kparams: output of prepare_params().
    Returns (B, 1) float32 = sigmoid(MLP(x))."""
    B, D = x.shape
    assert D == INPUT_DIM
    bt, num_tiles = _choose_tiling(B, batch_tile)

    flops = 2 * B * (INPUT_DIM * HIDDEN[0] + HIDDEN[0] * HIDDEN[1]
                     + HIDDEN[1] * HIDDEN[2] + HIDDEN[2] * OUT_DIM)
    weight_bytes = sum(int(v.size) * v.dtype.itemsize for v in kparams.values())
    cost = pl.CostEstimate(flops=flops, transcendentals=B,
                           bytes_accessed=B * (D * 4 + 4) + weight_bytes)

    def const_spec(arr):
        # Grid-invariant operand: whole array, single-buffered (no point
        # double-buffering a block whose index never changes).
        ndim = arr.ndim
        return pl.BlockSpec(arr.shape, lambda i: (0,) * ndim,
                            pipeline_mode=pl.Buffered(1))

    out = pl.pallas_call(
        adversary_kernel,
        out_shape=jax.ShapeDtypeStruct((B, OUT_DIM), jnp.float32),
        grid=(num_tiles,),
        in_specs=[
            pl.BlockSpec((bt, D), lambda i: (i, 0)),      # x: tiled over batch
            const_spec(kparams["w1"]), const_spec(kparams["b1"]),
            const_spec(kparams["w2"]), const_spec(kparams["b2"]),
            const_spec(kparams["w3"]), const_spec(kparams["b3"]),
            const_spec(kparams["w4"]),
            pl.BlockSpec(memory_space=pltpu.MemorySpace.SMEM),   # b4 scalar
        ],
        out_specs=pl.BlockSpec((bt, OUT_DIM), lambda i: (i, 0)),
        compiler_params=pltpu.CompilerParams(
            dimension_semantics=("parallel",),
            vmem_limit_bytes=32 * 1024 * 1024,
        ),
        cost_estimate=cost,
    )(x,
      kparams["w1"], kparams["b1"],
      kparams["w2"], kparams["b2"],
      kparams["w3"], kparams["b3"],
      kparams["w4"], kparams["b4"])
    return out


# --------------------------------------------------------------------------
# Parameter handling
# --------------------------------------------------------------------------
def init_params(key):
    """Deterministic init matching the PyTorch module:
    weights ~ Normal(0, 0.01), biases = 0.  Weights stored as (in, out)."""
    dims = (INPUT_DIM,) + HIDDEN + (OUT_DIM,)
    params = {}
    keys = jax.random.split(key, len(dims) - 1)
    for idx, (din, dout) in enumerate(zip(dims[:-1], dims[1:]), start=1):
        params[f"w{idx}"] = 0.01 * jax.random.normal(
            keys[idx - 1], (din, dout), dtype=jnp.float32)
        params[f"b{idx}"] = jnp.zeros((1, dout), dtype=jnp.float32)
    return params


def prepare_params(params):
    """One-time conversion of the f32 params into kernel-ready form:
    bf16 matmul weights, f32 biases, layer-3/4 zero-padded to 128 lanes,
    b4 as a (1,1) SMEM scalar.  Call once and reuse across forward calls."""
    H3 = HIDDEN[-1]                               # 64
    pad = LANE - H3
    w3 = jnp.pad(params["w3"].astype(jnp.bfloat16), ((0, 0), (0, pad)))
    b3 = jnp.pad(params["b3"].astype(jnp.float32), ((0, 0), (0, pad)))
    w4 = jnp.pad(params["w4"].reshape(1, H3).astype(jnp.float32),
                 ((0, 0), (0, pad)))
    return dict(
        w1=params["w1"].astype(jnp.bfloat16),
        b1=params["b1"].astype(jnp.float32),
        w2=params["w2"].astype(jnp.bfloat16),
        b2=params["b2"].astype(jnp.float32),
        w3=w3, b3=b3, w4=w4,
        b4=params["b4"].reshape(1, 1).astype(jnp.float32),
    )


def _reference(x, params):
    h = x
    for i in range(1, 4):
        h = jnp.maximum(h @ params[f"w{i}"] + params[f"b{i}"], 0.0)
    return jax.nn.sigmoid(h @ params["w4"] + params["b4"])


if __name__ == "__main__":
    key = jax.random.PRNGKey(0)
    k_param, k_x1, k_x2 = jax.random.split(key, 3)
    params = init_params(k_param)
    kparams = prepare_params(params)          # bf16 cast / lane-pad done ONCE

    # Small-batch path (single 8-row tile, weight-DMA bound).
    B_small = 8
    x_small = jax.random.normal(k_x1, (B_small, INPUT_DIM), dtype=jnp.float32)
    out_small = jax.block_until_ready(adversary_forward(x_small, kparams))
    ref_small = _reference(x_small, params)
    assert out_small.shape == (B_small, OUT_DIM)
    assert jnp.allclose(out_small, ref_small, atol=1e-2, rtol=1e-2)

    # Tiled path (2 grid steps of 152 rows, partial last block, megacore).
    B_big = 300
    x_big = jax.random.normal(k_x2, (B_big, INPUT_DIM), dtype=jnp.float32)
    out_big = jax.block_until_ready(adversary_forward(x_big, kparams))
    ref_big = _reference(x_big, params)
    assert out_big.shape == (B_big, OUT_DIM)
    assert jnp.allclose(out_big, ref_big, atol=1e-2, rtol=1e-2)

    print("KERNEL_OK")
</pallas_src>

<mosaic_0001>
module attributes {stable_mosaic.version = 11 : i64} {
  func.func @adversary_kernel(%arg0: i32, %arg1: memref<8x128xf32, #tpu.memory_space<vmem>>, %arg2: memref<128x1024xbf16, #tpu.memory_space<vmem>>, %arg3: memref<1x1024xf32, #tpu.memory_space<vmem>>, %arg4: memref<1024x512xbf16, #tpu.memory_space<vmem>>, %arg5: memref<1x512xf32, #tpu.memory_space<vmem>>, %arg6: memref<512x128xbf16, #tpu.memory_space<vmem>>, %arg7: memref<1x128xf32, #tpu.memory_space<vmem>>, %arg8: memref<1x128xf32, #tpu.memory_space<vmem>>, %arg9: memref<1x1xf32, #tpu.memory_space<smem>>, %arg10: memref<8x1xf32, #tpu.memory_space<vmem>>) attributes {dimension_semantics = [#tpu.dimension_semantics<parallel>], iteration_bounds = array<i64: 1>, scalar_prefetch = 0 : i64, scratch_operands = 0 : i64, tpu.core_type = #tpu.core_type<tc>, window_params = [{transform_indices = @transform_0, window_bounds = array<i64: 8, 128>}, {pipeline_mode = #tpu.pipeline_mode<synchronous>, transform_indices = @transform_1, window_bounds = array<i64: 128, 1024>}, {pipeline_mode = #tpu.pipeline_mode<synchronous>, transform_indices = @transform_2, window_bounds = array<i64: 1, 1024>}, {pipeline_mode = #tpu.pipeline_mode<synchronous>, transform_indices = @transform_3, window_bounds = array<i64: 1024, 512>}, {pipeline_mode = #tpu.pipeline_mode<synchronous>, transform_indices = @transform_4, window_bounds = array<i64: 1, 512>}, {pipeline_mode = #tpu.pipeline_mode<synchronous>, transform_indices = @transform_5, window_bounds = array<i64: 512, 128>}, {pipeline_mode = #tpu.pipeline_mode<synchronous>, transform_indices = @transform_6, window_bounds = array<i64: 1, 128>}, {pipeline_mode = #tpu.pipeline_mode<synchronous>, transform_indices = @transform_7, window_bounds = array<i64: 1, 128>}, {transform_indices = @transform_8, window_bounds = array<i64: 1, 1>}, {transform_indices = @transform_9, window_bounds = array<i64: 8, 1>}]} {
    %c0 = arith.constant 0 : index
    %c0_0 = arith.constant 0 : index
    %0 = vector.load %arg1[%c0, %c0_0] : memref<8x128xf32, #tpu.memory_space<vmem>>, vector<8x128xf32>
    %1 = arith.truncf %0 : vector<8x128xf32> to vector<8x128xbf16>
    %c0_1 = arith.constant 0 : index
    %c0_2 = arith.constant 0 : index
    %2 = vector.load %arg2[%c0_1, %c0_2] : memref<128x1024xbf16, #tpu.memory_space<vmem>>, vector<128x1024xbf16>
    %cst = arith.constant dense<0.000000e+00> : vector<8x1024xf32>
    %3 = tpu.matmul %1, %2, %cst {dimension_numbers = #tpu.dot_dimension_numbers<[1], [0], [0], [1], [0, 0, 1, 1], [], []>} : vector<8x128xbf16>, vector<128x1024xbf16>, vector<8x1024xf32> -> vector<8x1024xf32>
    %c0_3 = arith.constant 0 : index
    %c0_4 = arith.constant 0 : index
    %4 = vector.load %arg3[%c0_3, %c0_4] : memref<1x1024xf32, #tpu.memory_space<vmem>>, vector<1x1024xf32>
    %5 = vector.broadcast %4 : vector<1x1024xf32> to vector<8x1024xf32>
    %6 = arith.addf %3, %5 : vector<8x1024xf32>
    %cst_5 = arith.constant 0.000000e+00 : f32
    %7 = vector.broadcast %cst_5 : f32 to vector<8x1024xf32>
    %8 = arith.maximumf %6, %7 : vector<8x1024xf32>
    %9 = arith.truncf %8 : vector<8x1024xf32> to vector<8x1024xbf16>
    %c0_6 = arith.constant 0 : index
    %c0_7 = arith.constant 0 : index
    %10 = vector.load %arg4[%c0_6, %c0_7] : memref<1024x512xbf16, #tpu.memory_space<vmem>>, vector<1024x512xbf16>
    %cst_8 = arith.constant dense<0.000000e+00> : vector<8x512xf32>
    %11 = tpu.matmul %9, %10, %cst_8 {dimension_numbers = #tpu.dot_dimension_numbers<[1], [0], [0], [1], [0, 0, 1, 1], [], []>} : vector<8x1024xbf16>, vector<1024x512xbf16>, vector<8x512xf32> -> vector<8x512xf32>
    %c0_9 = arith.constant 0 : index
    %c0_10 = arith.constant 0 : index
    %12 = vector.load %arg5[%c0_9, %c0_10] : memref<1x512xf32, #tpu.memory_space<vmem>>, vector<1x512xf32>
    %13 = vector.broadcast %12 : vector<1x512xf32> to vector<8x512xf32>
    %14 = arith.addf %11, %13 : vector<8x512xf32>
    %cst_11 = arith.constant 0.000000e+00 : f32
    %15 = vector.broadcast %cst_11 : f32 to vector<8x512xf32>
    %16 = arith.maximumf %14, %15 : vector<8x512xf32>
    %17 = arith.truncf %16 : vector<8x512xf32> to vector<8x512xbf16>
    %c0_12 = arith.constant 0 : index
    %c0_13 = arith.constant 0 : index
    %18 = vector.load %arg6[%c0_12, %c0_13] : memref<512x128xbf16, #tpu.memory_space<vmem>>, vector<512x128xbf16>
    %cst_14 = arith.constant dense<0.000000e+00> : vector<8x128xf32>
    %19 = tpu.matmul %17, %18, %cst_14 {dimension_numbers = #tpu.dot_dimension_numbers<[1], [0], [0], [1], [0, 0, 1, 1], [], []>} : vector<8x512xbf16>, vector<512x128xbf16>, vector<8x128xf32> -> vector<8x128xf32>
    %c0_15 = arith.constant 0 : index
    %c0_16 = arith.constant 0 : index
    %20 = vector.load %arg7[%c0_15, %c0_16] : memref<1x128xf32, #tpu.memory_space<vmem>>, vector<1x128xf32>
    %21 = vector.broadcast %20 : vector<1x128xf32> to vector<8x128xf32>
    %22 = arith.addf %19, %21 : vector<8x128xf32>
    %cst_17 = arith.constant 0.000000e+00 : f32
    %23 = vector.broadcast %cst_17 : f32 to vector<8x128xf32>
    %24 = arith.maximumf %22, %23 : vector<8x128xf32>
    %c0_18 = arith.constant 0 : index
    %c0_19 = arith.constant 0 : index
    %25 = vector.load %arg8[%c0_18, %c0_19] : memref<1x128xf32, #tpu.memory_space<vmem>>, vector<1x128xf32>
    %26 = vector.broadcast %25 : vector<1x128xf32> to vector<8x128xf32>
    %27 = arith.mulf %24, %26 : vector<8x128xf32>
    %cst_20 = arith.constant dense<0.000000e+00> : vector<8xf32>
    %28 = vector.multi_reduction <add>, %27, %cst_20 [1] : vector<8x128xf32> to vector<8xf32>
    %29 = vector.shape_cast %28 : vector<8xf32> to vector<8x1xf32>
    %c0_21 = arith.constant 0 : index
    %c0_22 = arith.constant 0 : index
    %30 = memref.load %arg9[%c0_21, %c0_22] : memref<1x1xf32, #tpu.memory_space<smem>>
    %31 = vector.broadcast %30 : f32 to vector<8x1xf32>
    %32 = arith.addf %29, %31 : vector<8x1xf32>
    %33 = arith.negf %32 : vector<8x1xf32>
    %34 = math.exp %33 : vector<8x1xf32>
    %cst_23 = arith.constant 1.000000e+00 : f32
    %35 = vector.broadcast %cst_23 : f32 to vector<8x1xf32>
    %36 = arith.addf %35, %34 : vector<8x1xf32>
    %37 = arith.divf %35, %36 : vector<8x1xf32>
    %c0_24 = arith.constant 0 : index
    %c0_25 = arith.constant 0 : index
    %38 = vector.load %arg10[%c0_24, %c0_25] : memref<8x1xf32, #tpu.memory_space<vmem>>, vector<8x1xf32>
    tpu.vector_store %arg10[%c0_24, %c0_25], %37 {strides = array<i32>} : memref<8x1xf32, #tpu.memory_space<vmem>>, vector<8x1xf32>,
    return
  }
  func.func @transform_0(%arg0: i32) -> (i32, i32) {
    %c0_i32 = arith.constant 0 : i32
    %c0_i32_0 = arith.constant 0 : i32
    return %arg0, %c0_i32 : i32, i32
  }
  func.func @transform_1(%arg0: i32) -> (i32, i32) {
    %c0_i32 = arith.constant 0 : i32
    %c0_i32_0 = arith.constant 0 : i32
    %c0_i32_1 = arith.constant 0 : i32
    return %c0_i32, %c0_i32_0 : i32, i32
  }
  func.func @transform_2(%arg0: i32) -> (i32, i32) {
    %c0_i32 = arith.constant 0 : i32
    %c0_i32_0 = arith.constant 0 : i32
    %c0_i32_1 = arith.constant 0 : i32
    return %c0_i32, %c0_i32_0 : i32, i32
  }
  func.func @transform_3(%arg0: i32) -> (i32, i32) {
    %c0_i32 = arith.constant 0 : i32
    %c0_i32_0 = arith.constant 0 : i32
    %c0_i32_1 = arith.constant 0 : i32
    return %c0_i32, %c0_i32_0 : i32, i32
  }
  func.func @transform_4(%arg0: i32) -> (i32, i32) {
    %c0_i32 = arith.constant 0 : i32
    %c0_i32_0 = arith.constant 0 : i32
    %c0_i32_1 = arith.constant 0 : i32
    return %c0_i32, %c0_i32_0 : i32, i32
  }
  func.func @transform_5(%arg0: i32) -> (i32, i32) {
    %c0_i32 = arith.constant 0 : i32
    %c0_i32_0 = arith.constant 0 : i32
    %c0_i32_1 = arith.constant 0 : i32
    return %c0_i32, %c0_i32_0 : i32, i32
  }
  func.func @transform_6(%arg0: i32) -> (i32, i32) {
    %c0_i32 = arith.constant 0 : i32
    %c0_i32_0 = arith.constant 0 : i32
    %c0_i32_1 = arith.constant 0 : i32
    return %c0_i32, %c0_i32_0 : i32, i32
  }
  func.func @transform_7(%arg0: i32) -> (i32, i32) {
    %c0_i32 = arith.constant 0 : i32
    %c0_i32_0 = arith.constant 0 : i32
    %c0_i32_1 = arith.constant 0 : i32
    return %c0_i32, %c0_i32_0 : i32, i32
  }
  func.func @transform_8(%arg0: i32) -> (i32, i32) {
    %c0_i32 = arith.constant 0 : i32
    %c0_i32_0 = arith.constant 0 : i32
    %c0_i32_1 = arith.constant 0 : i32
    return %c0_i32, %c0_i32_0 : i32, i32
  }
  func.func @transform_9(%arg0: i32) -> (i32, i32) {
    %c0_i32 = arith.constant 0 : i32
    %c0_i32_0 = arith.constant 0 : i32
    return %arg0, %c0_i32 : i32, i32
  }
}

</mosaic_0001>

<bundles_post_ra>
// kernel: adversary_forward.1
= control target key start
LH: loop header
LB: loop body
LE: loop exit
PB: predicated region body
PF: predicated region fallthrough
CT: control target
= control target key end

     0   :  { %15 = vsyncpa [#allocation4], 0  ;;  %s5088_s0 = inlined_call_operand.hbm [shape: f32[8,128], index: 0, kind: input, shape index: {}]   ;;  %s5089_s1 = inlined_call_operand.hbm [shape: bf16[128,1024], index: 1, kind: input, shape index: {}]   ;;  %s5090_s2 = inlined_call_operand.hbm [shape: f32[1,1024], index: 2, kind: input, shape index: {}]   ;;  %s5091_s3 = inlined_call_operand.hbm [shape: bf16[1024,512], index: 3, kind: input, shape index: {}]   ;;  %s5092_s4 = inlined_call_operand.hbm [shape: f32[1,512], index: 4, kind: input, shape index: {}]   ;;  %s5093_s5 = inlined_call_operand.hbm [shape: bf16[512,128], index: 5, kind: input, shape index: {}]   ;;  %s5094_s6 = inlined_call_operand.vmem [shape: f32[1,128], index: 6, kind: input, shape index: {}]   ;;  %s5095_s7 = inlined_call_operand.vmem [shape: f32[1,128], index: 7, kind: input, shape index: {}]   ;;  %s5096_s8 = inlined_call_operand.<no memory space> [shape: f32[1,1], index: 8, kind: input, shape index: {}]   ;;  %s5097_s9 = inlined_call_operand.vmem [shape: f32[8,1], index: 9, kind: output, shape index: {}]  }
   0x1   :  { %16 = vsyncpa [#allocation6], 0 }
   0x2   :  { %17 = vsyncpa [#allocation9], 0  ;;  %s34_s11 = sshll.u32 %s5089_s1, 4  ;;  %s35_s11 = int_to_ptr.hbm [resolvable:$true] %s34_s11 }
   0x3   :  { %18 = vsyncpa [#allocation12], 0  ;;  %s4898_s12 = smov [#allocation5]   ;;  %s58_s16 = sshll.u32 %s5091_s3, 4  ;;  %s59_s16 = int_to_ptr.hbm [resolvable:$true] %s58_s16 }
   0x4   :  { %s36_s13 = sshll.u32 %s4898_s12, 4  ;;  %s4899_s17 = smov 512   ;;  %s37_s13 = int_to_ptr.vmem [resolvable:$true] %s36_s13 }
   0x5   :  { %s4900_s18 = smov 32   ;;  %s4901_s19 = smov [#allocation8]  }
   0x6   :  { %42 = dma.hbm_to_vmem [thread:$0]  %s35_s11, 8192, %s37_s13, [#allocation6], %s4899_s17, %s4899_s17, %s4900_s18  }
   0x7   :  { %s60_s20 = sshll.u32 %s4901_s19, 4  ;;  %s4902_s21 = smov 256   ;;  %s61_s20 = int_to_ptr.vmem [resolvable:$true] %s60_s20 }
   0x8   :  { %s4903_s22 = smov 16   ;;  %s24_s24 = sshll.u32 %s5088_s0, 4  ;;  %s25_s24 = int_to_ptr.hbm [resolvable:$true] %s24_s24 }
   0x9   :  { %66 = dma.hbm_to_vmem [thread:$0]  %s59_s16, 32768, %s61_s20, [#allocation9], %s4902_s21, %s4902_s21, %s4903_s22  }
   0xa   :  { %s4904_s25 = smov [#allocation3]   ;;  %s48_s28 = sshll.u32 %s5090_s2, 4  ;;  %s49_s28 = int_to_ptr.hbm [resolvable:$true] %s48_s28 }
   0xb   :  { %s26_s26 = sshll.u32 %s4904_s25, 4  ;;  %s4905_s29 = smov [#allocation7]   ;;  %s27_s26 = int_to_ptr.vmem [resolvable:$true] %s26_s26 }
   0xc   :  { %29 = dma.hbm_to_vmem [thread:$0]  %s25_s24, 128, %s27_s26, [#allocation4]  }
   0xd   :  { %s50_s30 = sshll.u32 %s4905_s29, 4  ;;  %s72_s12 = sshll.u32 %s5092_s4, 4  ;;  %s51_s30 = int_to_ptr.vmem [resolvable:$true] %s50_s30  ;;  %s73_s12 = int_to_ptr.hbm [resolvable:$true] %s72_s12 }
   0xe   :  { %53 = dma.hbm_to_vmem [thread:$0]  %s49_s28, 128, %s51_s30, [#allocation6]  }
   0xf   :  { %s82_s14 = sshll.u32 %s5093_s5, 4  ;;  %s4906_s15 = smov [#allocation10]   ;;  %s83_s14 = int_to_ptr.hbm [resolvable:$true] %s82_s14 }
  0x10   :  { %s74_s16 = sshll.u32 %s4906_s15, 4  ;;  %s4907_s2 = smov [#allocation11]   ;;  %s75_s16 = int_to_ptr.vmem [resolvable:$true] %s74_s16 }
  0x11   :  { %77 = dma.hbm_to_vmem [thread:$0]  %s73_s12, 64, %s75_s16, [#allocation9]  }
  0x12   :  { %s84_s17 = sshll.u32 %s4907_s2, 4  ;;  %s4908_s18 = smov 64   ;;  %s85_s17 = int_to_ptr.vmem [resolvable:$true] %s84_s17 }
  0x13   :  { %s4909_s19 = smov 4  }
  0x14   :  { %90 = dma.hbm_to_vmem [thread:$0]  %s83_s14, 4096, %s85_s17, [#allocation12], %s4908_s18, %s4908_s18, %s4909_s19  }
  0x15   :  { %4890 = dma.done.wait [#allocation4], 128  }
  0x16   :  { %4891 = vsyncadd [#allocation4], 4294967168 }
  0x17   :  { %4892 = dma.done.wait [#allocation6], 8320  }
  0x18   :  { %4893 = vsyncadd [#allocation6], 4294958976 }
  0x19   :  { %4894 = dma.done.wait [#allocation9], 32832  }
  0x1a   :  { %4895 = vsyncadd [#allocation9], 4294934464 }
  0x1b   :  { %4896 = dma.done.wait [#allocation12], 4096  }
  0x1c   :  { %4897 = vsyncadd [#allocation12], 4294963200  ;;  %v3193_v0 = vld [vmem:[#allocation5 + $0x1c0] sm:$0xf]  ;;  %v4432_v2 = vld [vmem:[#allocation5 + $0x1c4] sm:$0xf] }
  0x1d   :  { %v4436_v1 = vld [vmem:[#allocation5 + $0x1dc] sm:$0xf0]  ;;  %v3195_v4 = vld [vmem:[#allocation5 + $0x1e0] sm:$0xf0]  ;;  %v3201_v5 = vld [vmem:[#allocation5 + $0x1c8] sm:$0xf] }
  0x1e   :  { %v3194_v3 = vor.u32 %v4436_v1, %v3193_v0  ;;  %v4437_v6 = vld [vmem:[#allocation5 + $0x1e4] sm:$0xf0]  ;;  %v3198_v7 = vor.u32 %v4432_v2, %v3195_v4  ;;  %v4433_v9 = vld [vmem:[#allocation5 + $0x1cc] sm:$0xf]  ;;  %v3161_v11 = vld [vmem:[#allocation5 + $0x180] sm:$0xf] }
  0x1f   :  { %v3202_v8 = vor.u32 %v4437_v6, %v3201_v5  ;;  %v3203_v10 = vld [vmem:[#allocation5 + $0x1e8] sm:$0xf0]  ;;  %v4428_v13 = vld [vmem:[#allocation5 + $0x19c] sm:$0xf0]  ;;  %v4424_v14 = vld [vmem:[#allocation5 + $0x184] sm:$0xf] }
  0x20   :  { %525 = vmatpush.bf16.msra.mxu0 %v3194_v3  ;;  %v3206_v12 = vor.u32 %v4433_v9, %v3203_v10  ;;  %v3163_v15 = vld [vmem:[#allocation5 + $0x1a0] sm:$0xf0]  ;;  %538 = vmatpush.bf16.msra.mxu1 %v3198_v7  ;;  %v3162_v16 = vor.u32 %v4428_v13, %v3161_v11  ;;  %v3169_v18 = vld [vmem:[#allocation5 + $0x188] sm:$0xf]  ;;  %v4425_v20 = vld [vmem:[#allocation5 + $0x18c] sm:$0xf] }
  0x21   :  { %551 = vmatpush.bf16.msra.mxu2 %v3202_v8  ;;  %v3166_v17 = vor.u32 %v4424_v14, %v3163_v15  ;;  %v4429_v19 = vld [vmem:[#allocation5 + $0x1a4] sm:$0xf0]  ;;  %v3171_v22 = vld [vmem:[#allocation5 + $0x1a8] sm:$0xf0]  ;;  %v3129_v23 = vld [vmem:[#allocation5 + $0x140] sm:$0xf] }
  0x22   :  { %564 = vmatpush.bf16.msra.mxu3 %v3206_v12  ;;  %v3170_v21 = vor.u32 %v4429_v19, %v3169_v18  ;;  %v4420_v24 = vld [vmem:[#allocation5 + $0x15c] sm:$0xf0]  ;;  %v3174_v25 = vor.u32 %v4425_v20, %v3171_v22  ;;  %v4416_v26 = vld [vmem:[#allocation5 + $0x144] sm:$0xf]  ;;  %v3137_v28 = vld [vmem:[#allocation5 + $0x148] sm:$0xf] }
  0x23   :  { %v3131_v27 = vld [vmem:[#allocation5 + $0x160] sm:$0xf0]  ;;  %v3130_v29 = vor.u32 %v4420_v24, %v3129_v23  ;;  %v4421_v30 = vld [vmem:[#allocation5 + $0x164] sm:$0xf0]  ;;  %v4417_v31 = vld [vmem:[#allocation5 + $0x14c] sm:$0xf] }
  0x24   :  { %526 = vmatpush.bf16.msra.mxu0 %v3162_v16  ;;  %v3139_v32 = vld [vmem:[#allocation5 + $0x168] sm:$0xf0]  ;;  %539 = vmatpush.bf16.msra.mxu1 %v3166_v17  ;;  %v3134_v33 = vor.u32 %v4416_v26, %v3131_v27  ;;  %v3138_v34 = vor.u32 %v4421_v30, %v3137_v28  ;;  %v3097_v35 = vld [vmem:[#allocation5 + $0x100] sm:$0xf]  ;;  %v4408_v37 = vld [vmem:[#allocation5 + $0x104] sm:$0xf] }
  0x25   :  { %552 = vmatpush.bf16.msra.mxu2 %v3170_v21  ;;  %v4412_v36 = vld [vmem:[#allocation5 + $0x11c] sm:$0xf0]  ;;  %v3142_v38 = vor.u32 %v4417_v31, %v3139_v32  ;;  %v3099_v39 = vld [vmem:[#allocation5 + $0x120] sm:$0xf0]  ;;  %v3105_v40 = vld [vmem:[#allocation5 + $0x108] sm:$0xf] }
  0x26   :  { %565 = vmatpush.bf16.msra.mxu3 %v3174_v25  ;;  %v4413_v41 = vld [vmem:[#allocation5 + $0x124] sm:$0xf0]  ;;  %v4409_v42 = vld [vmem:[#allocation5 + $0x10c] sm:$0xf]  ;;  %v3098_v44 = vor.u32 %v4412_v36, %v3097_v35  ;;  %v3102_v45 = vor.u32 %v4408_v37, %v3099_v39  ;;  %v3065_v47 = vld [vmem:[#allocation5 + $0xc0] sm:$0xf] }
  0x27   :  { %v3107_v43 = vld [vmem:[#allocation5 + $0x128] sm:$0xf0]  ;;  %v3106_v46 = vor.u32 %v4413_v41, %v3105_v40  ;;  %v4404_v48 = vld [vmem:[#allocation5 + $0xdc] sm:$0xf0]  ;;  %v4400_v49 = vld [vmem:[#allocation5 + $0xc4] sm:$0xf] }
  0x28   :  { %527 = vmatpush.bf16.msra.mxu0 %v3130_v29  ;;  %540 = vmatpush.bf16.msra.mxu1 %v3134_v33  ;;  %v3110_v50 = vor.u32 %v4409_v42, %v3107_v43  ;;  %v3067_v51 = vld [vmem:[#allocation5 + $0xe0] sm:$0xf0]  ;;  %v3073_v52 = vld [vmem:[#allocation5 + $0xc8] sm:$0xf]  ;;  %v4401_v54 = vld [vmem:[#allocation5 + $0xcc] sm:$0xf]  ;;  %v3066_v56 = vor.u32 %v4404_v48, %v3065_v47 }
  0x29   :  { %553 = vmatpush.bf16.msra.mxu2 %v3138_v34  ;;  %v4405_v53 = vld [vmem:[#allocation5 + $0xe4] sm:$0xf0]  ;;  %v3075_v55 = vld [vmem:[#allocation5 + $0xe8] sm:$0xf0]  ;;  %v3070_v57 = vor.u32 %v4400_v49, %v3067_v51  ;;  %v3033_v59 = vld [vmem:[#allocation5 + $0x80] sm:$0xf] }
  0x2a   :  { %566 = vmatpush.bf16.msra.mxu3 %v3142_v38  ;;  %v3074_v58 = vor.u32 %v4405_v53, %v3073_v52  ;;  %v4396_v60 = vld [vmem:[#allocation5 + $0x9c] sm:$0xf0]  ;;  %v4392_v61 = vld [vmem:[#allocation5 + $0x84] sm:$0xf]  ;;  %v3078_v62 = vor.u32 %v4401_v54, %v3075_v55  ;;  %v3041_v0 = vld [vmem:[#allocation5 + $0x88] sm:$0xf] }
  0x2b   :  { %v3035_v63 = vld [vmem:[#allocation5 + $0xa0] sm:$0xf0]  ;;  %v4397_v1 = vld [vmem:[#allocation5 + $0xa4] sm:$0xf0]  ;;  %v4393_v2 = vld [vmem:[#allocation5 + $0x8c] sm:$0xf]  ;;  %v3034_v4 = vor.u32 %v4396_v60, %v3033_v59 }
  0x2c   :  { %528 = vmatpush.bf16.msra.mxu0 %v3098_v44  ;;  %541 = vmatpush.bf16.msra.mxu1 %v3102_v45  ;;  %v3043_v3 = vld [vmem:[#allocation5 + $0xa8] sm:$0xf0]  ;;  %v3038_v5 = vor.u32 %v4392_v61, %v3035_v63  ;;  %v3042_v6 = vor.u32 %v4397_v1, %v3041_v0  ;;  %v3001_v7 = vld [vmem:[#allocation5 + $0x40] sm:$0xf]  ;;  %v4384_v9 = vld [vmem:[#allocation5 + $0x44] sm:$0xf] }
  0x2d   :  { %554 = vmatpush.bf16.msra.mxu2 %v3106_v46  ;;  %v4388_v8 = vld [vmem:[#allocation5 + $0x5c] sm:$0xf0]  ;;  %v3046_v10 = vor.u32 %v4393_v2, %v3043_v3  ;;  %v3003_v11 = vld [vmem:[#allocation5 + $0x60] sm:$0xf0]  ;;  %v3009_v12 = vld [vmem:[#allocation5 + $0x48] sm:$0xf] }
  0x2e   :  { %567 = vmatpush.bf16.msra.mxu3 %v3110_v50  ;;  %v4389_v13 = vld [vmem:[#allocation5 + $0x64] sm:$0xf0]  ;;  %v4385_v14 = vld [vmem:[#allocation5 + $0x4c] sm:$0xf]  ;;  %v3002_v16 = vor.u32 %v4388_v8, %v3001_v7  ;;  %v2969_v17 = vld [vmem:[#allocation5] sm:$0xf]  ;;  %v3006_v19 = vor.u32 %v4384_v9, %v3003_v11 }
  0x2f   :  { %v3011_v15 = vld [vmem:[#allocation5 + $0x68] sm:$0xf0]  ;;  %v4380_v18 = vld [vmem:[#allocation5 + $0x1c] sm:$0xf0]  ;;  %v3010_v20 = vor.u32 %v4389_v13, %v3009_v12  ;;  %v4376_v21 = vld [vmem:[#allocation5 + $0x4] sm:$0xf] }
  0x30   :  { %529 = vmatpush.bf16.msra.mxu0 %v3066_v56  ;;  %542 = vmatpush.bf16.msra.mxu1 %v3070_v57  ;;  %v2971_v22 = vld [vmem:[#allocation5 + $0x20] sm:$0xf0]  ;;  %v2977_v23 = vld [vmem:[#allocation5 + $0x8] sm:$0xf]  ;;  %v3014_v24 = vor.u32 %v4385_v14, %v3011_v15  ;;  %v4377_v26 = vld [vmem:[#allocation5 + $0xc] sm:$0xf]  ;;  %v2970_v31 = vor.u32 %v4380_v18, %v2969_v17 }
  0x31   :  { %555 = vmatpush.bf16.msra.mxu2 %v3074_v58  ;;  %v4381_v25 = vld [vmem:[#allocation5 + $0x24] sm:$0xf0]  ;;  %v2979_v27 = vld [vmem:[#allocation5 + $0x28] sm:$0xf0]  ;;  %v3209_v28 = vld [vmem:[#allocation5 + $0x1d0] sm:$0xf]  ;;  %v2974_v35 = vor.u32 %v4376_v21, %v2971_v22 }
  0x32   :  { %568 = vmatpush.bf16.msra.mxu3 %v3078_v62  ;;  %v4438_v29 = vld [vmem:[#allocation5 + $0x1ec] sm:$0xf0]  ;;  %v4434_v30 = vld [vmem:[#allocation5 + $0x1d4] sm:$0xf]  ;;  %v3217_v33 = vld [vmem:[#allocation5 + $0x1d8] sm:$0xf]  ;;  %v2978_v36 = vor.u32 %v4381_v25, %v2977_v23  ;;  %v2982_v40 = vor.u32 %v4377_v26, %v2979_v27 }
  0x33   :  { %v3211_v32 = vld [vmem:[#allocation5 + $0x1f0] sm:$0xf0]  ;;  %v4439_v34 = vld [vmem:[#allocation5 + $0x1f4] sm:$0xf0]  ;;  %v4435_v37 = vld [vmem:[#allocation5 + $0x1dc] sm:$0xf]  ;;  %v3210_v41 = vor.u32 %v4438_v29, %v3209_v28 }
  0x34   :  { %530 = vmatpush.bf16.msra.mxu0 %v3034_v4  ;;  %543 = vmatpush.bf16.msra.mxu1 %v3038_v5  ;;  %v3219_v38 = vld [vmem:[#allocation5 + $0x1f8] sm:$0xf0]  ;;  %v3214_v42 = vor.u32 %v4434_v30, %v3211_v32  ;;  %v3218_v43 = vor.u32 %v4439_v34, %v3217_v33  ;;  %v3177_v44 = vld [vmem:[#allocation5 + $0x190] sm:$0xf]  ;;  %v4426_v46 = vld [vmem:[#allocation5 + $0x194] sm:$0xf] }
  0x35   :  { %556 = vmatpush.bf16.msra.mxu2 %v3042_v6  ;;  %v121_v39 = vld [vmem:[#allocation3] sm:$0xff]  ;;  %v4430_v45 = vld [vmem:[#allocation5 + $0x1ac] sm:$0xf0]  ;;  %v3222_v47 = vor.u32 %v4435_v37, %v3219_v38  ;;  %v3179_v49 = vld [vmem:[#allocation5 + $0x1b0] sm:$0xf0]  ;;  %vm2957_vm3 = vcmask 7168  }
  0x36   :  { %569 = vmatpush.bf16.msra.mxu3 %v3046_v10  ;;  %v4978_v48 = vpack.c.bf16 %v121_v39, %v121_v39  ;;  %v3185_v50 = vld [vmem:[#allocation5 + $0x198] sm:$0xf]  ;;  %v4427_v52 = vld [vmem:[#allocation5 + $0x19c] sm:$0xf]  ;;  %v3178_v54 = vor.u32 %v4430_v45, %v3177_v44  ;;  %v3182_v55 = vor.u32 %v4426_v46, %v3179_v49  ;;  %v3145_v57 = vld [vmem:[#allocation5 + $0x150] sm:$0xf] }
  0x37   :  { %v4431_v51 = vld [vmem:[#allocation5 + $0x1b4] sm:$0xf0]  ;;  %v3187_v53 = vld [vmem:[#allocation5 + $0x1b8] sm:$0xf0]  ;;  %v4422_v58 = vld [vmem:[#allocation5 + $0x16c] sm:$0xf0] }
  0x38   :  { %531 = vmatpush.bf16.msra.mxu0 %v3002_v16  ;;  %544 = vmatpush.bf16.msra.mxu1 %v3006_v19  ;;  %v3186_v56 = vor.u32 %v4431_v51, %v3185_v50  ;;  %v4418_v59 = vld [vmem:[#allocation5 + $0x154] sm:$0xf]  ;;  %v3190_v60 = vor.u32 %v4427_v52, %v3187_v53  ;;  %v3153_v62 = vld [vmem:[#allocation5 + $0x158] sm:$0xf]  ;;  %v4419_v0 = vld [vmem:[#allocation5 + $0x15c] sm:$0xf]  ;;  %v3146_v2 = vor.u32 %v4422_v58, %v3145_v57 }
  0x39   :  { %557 = vmatpush.bf16.msra.mxu2 %v3010_v20  ;;  %v3147_v61 = vld [vmem:[#allocation5 + $0x170] sm:$0xf0]  ;;  %v4423_v63 = vld [vmem:[#allocation5 + $0x174] sm:$0xf0]  ;;  %v3155_v1 = vld [vmem:[#allocation5 + $0x178] sm:$0xf0] }
  0x3a   :  { %570 = vmatpush.bf16.msra.mxu3 %v3014_v24  ;;  %v3150_v3 = vor.u32 %v4418_v59, %v3147_v61  ;;  %v3154_v4 = vor.u32 %v4423_v63, %v3153_v62  ;;  %v3113_v5 = vld [vmem:[#allocation5 + $0x110] sm:$0xf]  ;;  %v4410_v7 = vld [vmem:[#allocation5 + $0x114] sm:$0xf]  ;;  %v3158_v8 = vor.u32 %v4419_v0, %v3155_v1  ;;  %v3121_v10 = vld [vmem:[#allocation5 + $0x118] sm:$0xf] }
  0x3b   :  { %v4414_v6 = vld [vmem:[#allocation5 + $0x12c] sm:$0xf0]  ;;  %v3115_v9 = vld [vmem:[#allocation5 + $0x130] sm:$0xf0]  ;;  %v4415_v11 = vld [vmem:[#allocation5 + $0x134] sm:$0xf0] }
  0x3c   :  { %532 = vmatpush.bf16.msra.mxu0 %v2970_v31  ;;  %545 = vmatpush.bf16.msra.mxu1 %v2974_v35  ;;  %v4411_v12 = vld [vmem:[#allocation5 + $0x11c] sm:$0xf]  ;;  %v3114_v14 = vor.u32 %v4414_v6, %v3113_v5  ;;  %v3118_v15 = vor.u32 %v4410_v7, %v3115_v9  ;;  %v3122_v16 = vor.u32 %v4415_v11, %v3121_v10  ;;  %v3081_v17 = vld [vmem:[#allocation5 + $0xd0] sm:$0xf]  ;;  %v4402_v19 = vld [vmem:[#allocation5 + $0xd4] sm:$0xf] }
  0x3d   :  { %558 = vmatpush.bf16.msra.mxu2 %v2978_v36  ;;  %v3123_v13 = vld [vmem:[#allocation5 + $0x138] sm:$0xf0]  ;;  %v4406_v18 = vld [vmem:[#allocation5 + $0xec] sm:$0xf0]  ;;  %v3083_v21 = vld [vmem:[#allocation5 + $0xf0] sm:$0xf0] }
  0x3e   :  { %571 = vmatpush.bf16.msra.mxu3 %v2982_v40  ;;  %v3126_v20 = vor.u32 %v4411_v12, %v3123_v13  ;;  %v3089_v22 = vld [vmem:[#allocation5 + $0xd8] sm:$0xf]  ;;  %v4403_v24 = vld [vmem:[#allocation5 + $0xdc] sm:$0xf]  ;;  %v3082_v26 = vor.u32 %v4406_v18, %v3081_v17  ;;  %v3086_v27 = vor.u32 %v4402_v19, %v3083_v21  ;;  %v3049_v29 = vld [vmem:[#allocation5 + $0x90] sm:$0xf] }
  0x3f   :  { %533 = vmatmul.bf16.vlgmr.msra.gmra.mxu0 %v4978_v48  ;;  %546 = vmatmul.bf16.vlgmr.msra.gmra.mxu1 %v4978_v48  ;;  %v4407_v23 = vld [vmem:[#allocation5 + $0xf4] sm:$0xf0]  ;;  %v3091_v25 = vld [vmem:[#allocation5 + $0xf8] sm:$0xf0]  ;;  %v4398_v30 = vld [vmem:[#allocation5 + $0xac] sm:$0xf0] }
  0x40   :  { %577 = vmatpush.bf16.msrb.mxu0 %v3210_v41  ;;  %590 = vmatpush.bf16.msrb.mxu1 %v3214_v42  ;;  %v3090_v28 = vor.u32 %v4407_v23, %v3089_v22  ;;  %v4394_v31 = vld [vmem:[#allocation5 + $0x94] sm:$0xf]  ;;  %v3094_v32 = vor.u32 %v4403_v24, %v3091_v25  ;;  %v3057_v34 = vld [vmem:[#allocation5 + $0x98] sm:$0xf]  ;;  %v4395_v36 = vld [vmem:[#allocation5 + $0x9c] sm:$0xf]  ;;  %v3050_v38 = vor.u32 %v4398_v30, %v3049_v29 }
  0x41   :  { %603 = vmatpush.bf16.msrb.mxu2 %v3218_v43  ;;  %572 = vmatmul.bf16.vlgmr.msra.gmra.mxu3 %v4978_v48  ;;  %v3051_v33 = vld [vmem:[#allocation5 + $0xb0] sm:$0xf0]  ;;  %v4399_v35 = vld [vmem:[#allocation5 + $0xb4] sm:$0xf0]  ;;  %v3059_v37 = vld [vmem:[#allocation5 + $0xb8] sm:$0xf0] }
  0x42   :  { %616 = vmatpush.bf16.msrb.mxu3 %v3222_v47  ;;  %559 = vmatmul.bf16.vlgmr.msra.gmra.mxu2 %v4978_v48  ;;  %v3054_v39 = vor.u32 %v4394_v31, %v3051_v33  ;;  %v3058_v40 = vor.u32 %v4399_v35, %v3057_v34  ;;  %v3017_v41 = vld [vmem:[#allocation5 + $0x50] sm:$0xf]  ;;  %v4386_v43 = vld [vmem:[#allocation5 + $0x54] sm:$0xf]  ;;  %v3062_v44 = vor.u32 %v4395_v36, %v3059_v37  ;;  %v3025_v46 = vld [vmem:[#allocation5 + $0x58] sm:$0xf] }
  0x43   :  { %v4390_v42 = vld [vmem:[#allocation5 + $0x6c] sm:$0xf0]  ;;  %v3019_v45 = vld [vmem:[#allocation5 + $0x70] sm:$0xf0]  ;;  %v4391_v47 = vld [vmem:[#allocation5 + $0x74] sm:$0xf0] }
  0x44   :  { %578 = vmatpush.bf16.msrb.mxu0 %v3178_v54  ;;  %591 = vmatpush.bf16.msrb.mxu1 %v3182_v55  ;;  %v4387_v49 = vld [vmem:[#allocation5 + $0x5c] sm:$0xf]  ;;  %v3018_v51 = vor.u32 %v4390_v42, %v3017_v41  ;;  %v2985_v52 = vld [vmem:[#allocation5 + $0x10] sm:$0xf]  ;;  %v3022_v53 = vor.u32 %v4386_v43, %v3019_v45  ;;  %v3026_v54 = vor.u32 %v4391_v47, %v3025_v46  ;;  %v2987_v57 = vld [vmem:[#allocation5 + $0x30] sm:$0xf0] }
  0x45   :  { %604 = vmatpush.bf16.msrb.mxu2 %v3186_v56  ;;  %v3027_v50 = vld [vmem:[#allocation5 + $0x78] sm:$0xf0]  ;;  %v4382_v55 = vld [vmem:[#allocation5 + $0x2c] sm:$0xf0]  ;;  %v4378_v56 = vld [vmem:[#allocation5 + $0x14] sm:$0xf] }
  0x46   :  { %617 = vmatpush.bf16.msrb.mxu3 %v3190_v60  ;;  %v3030_v58 = vor.u32 %v4387_v49, %v3027_v50  ;;  %v2993_v59 = vld [vmem:[#allocation5 + $0x18] sm:$0xf]  ;;  %v4379_v61 = vld [vmem:[#allocation5 + $0x1c] sm:$0xf]  ;;  %v3337_v63 = vld [vmem:[#allocation8 + $0xe0] sm:$0xf]  ;;  %v2986_v1 = vor.u32 %v4382_v55, %v2985_v52 }
  0x47   :  { %v4383_v60 = vld [vmem:[#allocation5 + $0x34] sm:$0xf0]  ;;  %v2995_v62 = vld [vmem:[#allocation5 + $0x38] sm:$0xf0]  ;;  %v3593_v9 = vld [vmem:[#allocation8 + $0x2e0] sm:$0xf] }
  0x48   :  { %579 = vmatpush.bf16.msrb.mxu0 %v3146_v2  ;;  %592 = vmatpush.bf16.msrb.mxu1 %v3150_v3  ;;  %v4470_v0 = vld [vmem:[#allocation8 + $0xec] sm:$0xf0]  ;;  %v3465_v2 = vld [vmem:[#allocation8 + $0x1e0] sm:$0xf]  ;;  %v2994_v5 = vor.u32 %v4383_v60, %v2993_v59  ;;  %v2998_v6 = vor.u32 %v4379_v61, %v2995_v62 }
  0x49   :  { %605 = vmatpush.bf16.msrb.mxu2 %v3154_v4  ;;  %v4502_v3 = vld [vmem:[#allocation8 + $0x1ec] sm:$0xf0]  ;;  %v2990_v4 = vor.u32 %v4378_v56, %v2987_v57  ;;  %v3338_v7 = vor.u32 %v4470_v0, %v3337_v63  ;;  %v3721_v13 = vld [vmem:[#allocation8 + $0x3e0] sm:$0xf] }
  0x4a   :  { %618 = vmatpush.bf16.msrb.mxu3 %v3158_v8  ;;  %v3321_v8 = vld [vmem:[#allocation8 + $0xc0] sm:$0xf]  ;;  %v4534_v10 = vld [vmem:[#allocation8 + $0x2ec] sm:$0xf0]  ;;  %v3466_v11 = vor.u32 %v4502_v3, %v3465_v2 }
  0x4b   :  { %v4466_v12 = vld [vmem:[#allocation8 + $0xcc] sm:$0xf0]  ;;  %v3594_v17 = vor.u32 %v4534_v10, %v3593_v9  ;;  %v3577_v21 = vld [vmem:[#allocation8 + $0x2c0] sm:$0xf] }
  0x4c   :  { %580 = vmatpush.bf16.msrb.mxu0 %v3114_v14  ;;  %593 = vmatpush.bf16.msrb.mxu1 %v3118_v15  ;;  %v4566_v14 = vld [vmem:[#allocation8 + $0x3ec] sm:$0xf0]  ;;  %v3449_v15 = vld [vmem:[#allocation8 + $0x1c0] sm:$0xf]  ;;  %v3322_v18 = vor.u32 %v4466_v12, %v3321_v8 }
  0x4d   :  { %606 = vmatpush.bf16.msrb.mxu2 %v3122_v16  ;;  %v4498_v16 = vld [vmem:[#allocation8 + $0x1cc] sm:$0xf0]  ;;  %v3722_v19 = vor.u32 %v4566_v14, %v3721_v13  ;;  %v3705_v25 = vld [vmem:[#allocation8 + $0x3c0] sm:$0xf] }
  0x4e   :  { %619 = vmatpush.bf16.msrb.mxu3 %v3126_v20  ;;  %v3305_v20 = vld [vmem:[#allocation8 + $0xa0] sm:$0xf]  ;;  %v4530_v22 = vld [vmem:[#allocation8 + $0x2cc] sm:$0xf0]  ;;  %v3450_v23 = vor.u32 %v4498_v16, %v3449_v15 }
  0x4f   :  { %v4462_v24 = vld [vmem:[#allocation8 + $0xac] sm:$0xf0]  ;;  %v3578_v29 = vor.u32 %v4530_v22, %v3577_v21  ;;  %v3561_v33 = vld [vmem:[#allocation8 + $0x2a0] sm:$0xf] }
  0x50   :  { %581 = vmatpush.bf16.msrb.mxu0 %v3082_v26  ;;  %594 = vmatpush.bf16.msrb.mxu1 %v3086_v27  ;;  %v4562_v26 = vld [vmem:[#allocation8 + $0x3cc] sm:$0xf0]  ;;  %v3433_v27 = vld [vmem:[#allocation8 + $0x1a0] sm:$0xf]  ;;  %v3306_v30 = vor.u32 %v4462_v24, %v3305_v20 }
  0x51   :  { %607 = vmatpush.bf16.msrb.mxu2 %v3090_v28  ;;  %v4494_v28 = vld [vmem:[#allocation8 + $0x1ac] sm:$0xf0]  ;;  %v3706_v31 = vor.u32 %v4562_v26, %v3705_v25  ;;  %v3689_v37 = vld [vmem:[#allocation8 + $0x3a0] sm:$0xf] }
  0x52   :  { %620 = vmatpush.bf16.msrb.mxu3 %v3094_v32  ;;  %v3289_v32 = vld [vmem:[#allocation8 + $0x80] sm:$0xf]  ;;  %v4526_v34 = vld [vmem:[#allocation8 + $0x2ac] sm:$0xf0]  ;;  %v3434_v35 = vor.u32 %v4494_v28, %v3433_v27 }
  0x53   :  { %v4458_v36 = vld [vmem:[#allocation8 + $0x8c] sm:$0xf0]  ;;  %v3562_v41 = vor.u32 %v4526_v34, %v3561_v33  ;;  %v3273_v42 = vld [vmem:[#allocation8 + $0x60] sm:$0xf] }
  0x54   :  { %582 = vmatpush.bf16.msrb.mxu0 %v3050_v38  ;;  %595 = vmatpush.bf16.msrb.mxu1 %v3054_v39  ;;  %v4558_v38 = vld [vmem:[#allocation8 + $0x3ac] sm:$0xf0]  ;;  %v3417_v39 = vld [vmem:[#allocation8 + $0x180] sm:$0xf]  ;;  %v3290_v43 = vor.u32 %v4458_v36, %v3289_v32 }
  0x55   :  { %608 = vmatpush.bf16.msrb.mxu2 %v3058_v40  ;;  %v4490_v40 = vld [vmem:[#allocation8 + $0x18c] sm:$0xf0]  ;;  %v3545_v45 = vld [vmem:[#allocation8 + $0x280] sm:$0xf] }
  0x56   :  { %621 = vmatpush.bf16.msrb.mxu3 %v3062_v44  ;;  %v3690_v44 = vor.u32 %v4558_v38, %v3689_v37  ;;  %v4522_v46 = vld [vmem:[#allocation8 + $0x28c] sm:$0xf0]  ;;  %v3418_v47 = vor.u32 %v4490_v40, %v3417_v39  ;;  %v3673_v49 = vld [vmem:[#allocation8 + $0x380] sm:$0xf] }
  0x57   :  { %v4554_v50 = vld [vmem:[#allocation8 + $0x38c] sm:$0xf0]  ;;  %v3257_v56 = vld [vmem:[#allocation8 + $0x40] sm:$0xf] }
  0x58   :  { %583 = vmatpush.bf16.msrb.mxu0 %v3018_v51  ;;  %596 = vmatpush.bf16.msrb.mxu1 %v3022_v53  ;;  %v3401_v51 = vld [vmem:[#allocation8 + $0x160] sm:$0xf]  ;;  %v4486_v52 = vld [vmem:[#allocation8 + $0x16c] sm:$0xf0]  ;;  %v3546_v53 = vor.u32 %v4522_v46, %v3545_v45  ;;  %v3674_v55 = vor.u32 %v4554_v50, %v3673_v49 }
  0x59   :  { %609 = vmatpush.bf16.msrb.mxu2 %v3026_v54  ;;  %v3529_v57 = vld [vmem:[#allocation8 + $0x260] sm:$0xf]  ;;  %v3402_v59 = vor.u32 %v4486_v52, %v3401_v51  ;;  %v4450_v60 = vld [vmem:[#allocation8 + $0x4c] sm:$0xf0] }
  0x5a   :  { %622 = vmatpush.bf16.msrb.mxu3 %v3030_v58  ;;  %v4518_v58 = vld [vmem:[#allocation8 + $0x26c] sm:$0xf0]  ;;  %v3657_v61 = vld [vmem:[#allocation8 + $0x360] sm:$0xf]  ;;  %v3258_v2 = vor.u32 %v4450_v60, %v3257_v56 }
  0x5b   :  { %v4550_v62 = vld [vmem:[#allocation8 + $0x36c] sm:$0xf0]  ;;  %v3385_v63 = vld [vmem:[#allocation8 + $0x140] sm:$0xf] }
  0x5c   :  { %584 = vmatpush.bf16.msrb.mxu0 %v2986_v1  ;;  %597 = vmatpush.bf16.msrb.mxu1 %v2990_v4  ;;  %v4482_v0 = vld [vmem:[#allocation8 + $0x14c] sm:$0xf0]  ;;  %v3530_v1 = vor.u32 %v4518_v58, %v3529_v57  ;;  %v3658_v3 = vor.u32 %v4550_v62, %v3657_v61  ;;  %v3241_v4 = vld [vmem:[#allocation8 + $0x20] sm:$0xf] }
  0x5d   :  { %610 = vmatpush.bf16.msrb.mxu2 %v2994_v5  ;;  %v3513_v5 = vld [vmem:[#allocation8 + $0x240] sm:$0xf]  ;;  %v4446_v8 = vld [vmem:[#allocation8 + $0x2c] sm:$0xf0] }
  0x5e   :  { %623 = vmatpush.bf16.msrb.mxu3 %v2998_v6  ;;  %v4514_v6 = vld [vmem:[#allocation8 + $0x24c] sm:$0xf0]  ;;  %v3641_v9 = vld [vmem:[#allocation8 + $0x340] sm:$0xf]  ;;  %v3242_v15 = vor.u32 %v4446_v8, %v3241_v4 }
  0x5f   :  { %585 = vmatmul.bf16.vlgmr.msrb.gmra.mxu0 %v4978_v48  ;;  %598 = vmatmul.bf16.vlgmr.msrb.gmra.mxu1 %v4978_v48  ;;  %v4546_v10 = vld [vmem:[#allocation8 + $0x34c] sm:$0xf0]  ;;  %v3514_v13 = vor.u32 %v4514_v6, %v3513_v5  ;;  %v3225_v14 = vld [vmem:[#allocation8] sm:$0xf] }
  0x60   :  { %2191 = vmatpush.bf16.msra.mxu0 %v3338_v7  ;;  %2204 = vmatpush.bf16.msra.mxu1 %v3466_v11  ;;  %v3386_v7 = vor.u32 %v4482_v0, %v3385_v63  ;;  %v3369_v11 = vld [vmem:[#allocation8 + $0x120] sm:$0xf]  ;;  %v4478_v12 = vld [vmem:[#allocation8 + $0x12c] sm:$0xf0]  ;;  %v3642_v16 = vor.u32 %v4546_v10, %v3641_v9 }
  0x61   :  { %611 = vmatmul.bf16.vlgmr.msrb.gmra.mxu2 %v4978_v48  ;;  %624 = vmatmul.bf16.vlgmr.msrb.gmra.mxu3 %v4978_v48  ;;  %v4454_v48 = vld [vmem:[#allocation8 + $0x6c] sm:$0xf0]  ;;  %v3370_v20 = vor.u32 %v4478_v12, %v3369_v11  ;;  %v3353_v21 = vld [vmem:[#allocation8 + $0x100] sm:$0xf] }
  0x62   :  { %2217 = vmatpush.bf16.msra.mxu2 %v3594_v17  ;;  %2230 = vmatpush.bf16.msra.mxu3 %v3722_v19  ;;  %v3274_v54 = vor.u32 %v4454_v48, %v3273_v42  ;;  %v4442_v17 = vld [vmem:[#allocation8 + $0xc] sm:$0xf0]  ;;  %v3625_v22 = vld [vmem:[#allocation8 + $0x320] sm:$0xf] }
  0x63   :  { %v4510_v19 = vld [vmem:[#allocation8 + $0x22c] sm:$0xf0]  ;;  %v3849_v25 = vld [vmem:[#allocation8 + $0x4e0] sm:$0xf] }
  0x64   :  { %2192 = vmatpush.bf16.msra.mxu0 %v3322_v18  ;;  %2205 = vmatpush.bf16.msra.mxu1 %v3450_v23  ;;  %v3497_v18 = vld [vmem:[#allocation8 + $0x220] sm:$0xf]  ;;  %v4542_v23 = vld [vmem:[#allocation8 + $0x32c] sm:$0xf0] }
  0x65   :  { %v4474_v24 = vld [vmem:[#allocation8 + $0x10c] sm:$0xf0]  ;;  %v3977_v27 = vld [vmem:[#allocation8 + $0x5e0] sm:$0xf] }
  0x66   :  { %2218 = vmatpush.bf16.msra.mxu2 %v3578_v29  ;;  %2231 = vmatpush.bf16.msra.mxu3 %v3706_v31  ;;  %v4598_v26 = vld [vmem:[#allocation8 + $0x4ec] sm:$0xf0]  ;;  %v3498_v29 = vor.u32 %v4510_v19, %v3497_v18  ;;  %v3626_v31 = vor.u32 %v4542_v23, %v3625_v22  ;;  %v3833_v32 = vld [vmem:[#allocation8 + $0x4c0] sm:$0xf]  ;;  %v3354_v36 = vor.u32 %v4474_v24, %v3353_v21 }
  0x67   :  { %v4630_v28 = vld [vmem:[#allocation8 + $0x5ec] sm:$0xf0]  ;;  %v3481_v33 = vld [vmem:[#allocation8 + $0x200] sm:$0xf]  ;;  %v3850_v37 = vor.u32 %v4598_v26, %v3849_v25 }
  0x68   :  { %2193 = vmatpush.bf16.msra.mxu0 %v3306_v30  ;;  %2206 = vmatpush.bf16.msra.mxu1 %v3434_v35  ;;  %v3226_v30 = vor.u32 %v4442_v17, %v3225_v14  ;;  %v4506_v34 = vld [vmem:[#allocation8 + $0x20c] sm:$0xf0]  ;;  %v3609_v35 = vld [vmem:[#allocation8 + $0x300] sm:$0xf] }
  0x69   :  { %v4538_v38 = vld [vmem:[#allocation8 + $0x30c] sm:$0xf0]  ;;  %v4105_v39 = vld [vmem:[#allocation8 + $0x6e0] sm:$0xf]  ;;  %v3482_v46 = vor.u32 %v4506_v34, %v3481_v33 }
  0x6a   :  { %2219 = vmatpush.bf16.msra.mxu2 %v3562_v41  ;;  %2232 = vmatpush.bf16.msra.mxu3 %v3690_v44  ;;  %v4662_v40 = vld [vmem:[#allocation8 + $0x6ec] sm:$0xf0]  ;;  %v3978_v41 = vor.u32 %v4630_v28, %v3977_v27  ;;  %v4233_v48 = vld [vmem:[#allocation8 + $0x7e0] sm:$0xf] }
  0x6b   :  { %v4594_v42 = vld [vmem:[#allocation8 + $0x4cc] sm:$0xf0]  ;;  %v3961_v44 = vld [vmem:[#allocation8 + $0x5c0] sm:$0xf]  ;;  %v4106_v49 = vor.u32 %v4662_v40, %v4105_v39 }
  0x6c   :  { %2194 = vmatpush.bf16.msra.mxu0 %v3290_v43  ;;  %2207 = vmatpush.bf16.msra.mxu1 %v3418_v47  ;;  %v4694_v43 = vld [vmem:[#allocation8 + $0x7ec] sm:$0xf0]  ;;  %v3610_v47 = vor.u32 %v4538_v38, %v3609_v35  ;;  %v3834_v50 = vor.u32 %v4594_v42, %v3833_v32  ;;  %v3817_v52 = vld [vmem:[#allocation8 + $0x4a0] sm:$0xf] }
  0x6d   :  { %v4626_v45 = vld [vmem:[#allocation8 + $0x5cc] sm:$0xf0]  ;;  %v4234_v51 = vor.u32 %v4694_v43, %v4233_v48  ;;  %v4217_v57 = vld [vmem:[#allocation8 + $0x7c0] sm:$0xf] }
  0x6e   :  { %2220 = vmatpush.bf16.msra.mxu2 %v3546_v53  ;;  %2233 = vmatpush.bf16.msra.mxu3 %v3674_v55  ;;  %v4089_v53 = vld [vmem:[#allocation8 + $0x6c0] sm:$0xf]  ;;  %v3962_v55 = vor.u32 %v4626_v45, %v3961_v44  ;;  %v4590_v56 = vld [vmem:[#allocation8 + $0x4ac] sm:$0xf0] }
  0x6f   :  { %v4690_v58 = vld [vmem:[#allocation8 + $0x7cc] sm:$0xf0]  ;;  %v3818_v62 = vor.u32 %v4590_v56, %v3817_v52  ;;  %v3801_v0 = vld [vmem:[#allocation8 + $0x480] sm:$0xf] }
  0x70   :  { %2195 = vmatpush.bf16.msra.mxu0 %v3274_v54  ;;  %2208 = vmatpush.bf16.msra.mxu1 %v3402_v59  ;;  %v4658_v54 = vld [vmem:[#allocation8 + $0x6cc] sm:$0xf0]  ;;  %v3945_v59 = vld [vmem:[#allocation8 + $0x5a0] sm:$0xf]  ;;  %v4218_v63 = vor.u32 %v4690_v58, %v4217_v57 }
  0x71   :  { %v4622_v60 = vld [vmem:[#allocation8 + $0x5ac] sm:$0xf0]  ;;  %v4090_v61 = vor.u32 %v4658_v54, %v4089_v53  ;;  %v4201_v5 = vld [vmem:[#allocation8 + $0x7a0] sm:$0xf] }
  0x72   :  { %2221 = vmatpush.bf16.msra.mxu2 %v3530_v1  ;;  %2234 = vmatpush.bf16.msra.mxu3 %v3658_v3  ;;  %v4073_v1 = vld [vmem:[#allocation8 + $0x6a0] sm:$0xf]  ;;  %v3946_v3 = vor.u32 %v4622_v60, %v3945_v59  ;;  %v4586_v4 = vld [vmem:[#allocation8 + $0x48c] sm:$0xf0] }
  0x73   :  { %v4686_v6 = vld [vmem:[#allocation8 + $0x7ac] sm:$0xf0]  ;;  %v3802_v10 = vor.u32 %v4586_v4, %v3801_v0  ;;  %v3785_v12 = vld [vmem:[#allocation8 + $0x460] sm:$0xf] }
  0x74   :  { %2196 = vmatpush.bf16.msra.mxu0 %v3258_v2  ;;  %2209 = vmatpush.bf16.msra.mxu1 %v3386_v7  ;;  %v4654_v2 = vld [vmem:[#allocation8 + $0x6ac] sm:$0xf0]  ;;  %v3929_v7 = vld [vmem:[#allocation8 + $0x580] sm:$0xf]  ;;  %v4202_v11 = vor.u32 %v4686_v6, %v4201_v5 }
  0x75   :  { %v4618_v8 = vld [vmem:[#allocation8 + $0x58c] sm:$0xf0]  ;;  %v4074_v9 = vor.u32 %v4654_v2, %v4073_v1  ;;  %v4185_v17 = vld [vmem:[#allocation8 + $0x780] sm:$0xf] }
  0x76   :  { %2222 = vmatpush.bf16.msra.mxu2 %v3514_v13  ;;  %2235 = vmatpush.bf16.msra.mxu3 %v3642_v16  ;;  %v4057_v13 = vld [vmem:[#allocation8 + $0x680] sm:$0xf]  ;;  %v4650_v14 = vld [vmem:[#allocation8 + $0x68c] sm:$0xf0] }
  0x77   :  { %v4582_v16 = vld [vmem:[#allocation8 + $0x46c] sm:$0xf0]  ;;  %v3913_v19 = vld [vmem:[#allocation8 + $0x560] sm:$0xf]  ;;  %v4058_v21 = vor.u32 %v4650_v14, %v4057_v13  ;;  %v3467_v13 = vld [vmem:[#allocation8 + $0x1f0] sm:$0xf0] }
  0x78   :  { %2197 = vmatpush.bf16.msra.mxu0 %v3242_v15  ;;  %2210 = vmatpush.bf16.msra.mxu1 %v3370_v20  ;;  %v3930_v15 = vor.u32 %v4618_v8, %v3929_v7  ;;  %v4682_v18 = vld [vmem:[#allocation8 + $0x78c] sm:$0xf0]  ;;  %v3786_v22 = vor.u32 %v4582_v16, %v3785_v12  ;;  %v3769_v25 = vld [vmem:[#allocation8 + $0x440] sm:$0xf]  ;;  %v4500_v12 = vld [vmem:[#allocation8 + $0x1e4] sm:$0xf] }
  0x79   :  { %v4614_v20 = vld [vmem:[#allocation8 + $0x56c] sm:$0xf0]  ;;  %v4186_v23 = vor.u32 %v4682_v18, %v4185_v17  ;;  %v3897_v27 = vld [vmem:[#allocation8 + $0x540] sm:$0xf] }
  0x7a   :  { %2223 = vmatpush.bf16.msra.mxu2 %v3498_v29  ;;  %2236 = vmatpush.bf16.msra.mxu3 %v3626_v31  ;;  %v3914_v24 = vor.u32 %v4614_v20, %v3913_v19  ;;  %v4578_v26 = vld [vmem:[#allocation8 + $0x44c] sm:$0xf0]  ;;  %v4041_v31 = vld [vmem:[#allocation8 + $0x660] sm:$0xf]  ;;  %v3470_v20 = vor.u32 %v4500_v12, %v3467_v13  ;;  %v4520_v12 = vld [vmem:[#allocation8 + $0x284] sm:$0xf] }
  0x7b   :  { %v4610_v28 = vld [vmem:[#allocation8 + $0x54c] sm:$0xf0]  ;;  %v3770_v29 = vor.u32 %v4578_v26, %v3769_v25  ;;  %v4169_v33 = vld [vmem:[#allocation8 + $0x760] sm:$0xf]  ;;  %v3451_v25 = vld [vmem:[#allocation8 + $0x1d0] sm:$0xf0] }
  0x7c   :  { %2198 = vmatpush.bf16.msra.mxu0 %v3226_v30  ;;  %2211 = vmatpush.bf16.msra.mxu1 %v3354_v36  ;;  %v3898_v30 = vor.u32 %v4610_v28, %v3897_v27  ;;  %v4646_v32 = vld [vmem:[#allocation8 + $0x66c] sm:$0xf0]  ;;  %v3881_v40 = vld [vmem:[#allocation8 + $0x520] sm:$0xf]  ;;  %v3547_v13 = vld [vmem:[#allocation8 + $0x290] sm:$0xf0] }
  0x7d   :  { %v4042_v34 = vor.u32 %v4646_v32, %v4041_v31  ;;  %v4678_v35 = vld [vmem:[#allocation8 + $0x76c] sm:$0xf0]  ;;  %v4025_v48 = vld [vmem:[#allocation8 + $0x640] sm:$0xf]  ;;  %v4532_v31 = vld [vmem:[#allocation8 + $0x2e4] sm:$0xf] }
  0x7e   :  { %2224 = vmatpush.bf16.msra.mxu2 %v3482_v46  ;;  %2237 = vmatpush.bf16.msra.mxu3 %v3610_v47  ;;  %v4170_v36 = vor.u32 %v4678_v35, %v4169_v33  ;;  %v4574_v38 = vld [vmem:[#allocation8 + $0x42c] sm:$0xf0]  ;;  %v4153_v44 = vld [vmem:[#allocation8 + $0x740] sm:$0xf]  ;;  %v3595_v32 = vld [vmem:[#allocation8 + $0x2f0] sm:$0xf0] }
  0x7f   :  { %v4642_v43 = vld [vmem:[#allocation8 + $0x64c] sm:$0xf0]  ;;  %v4137_v58 = vld [vmem:[#allocation8 + $0x720] sm:$0xf]  ;;  %v4564_v33 = vld [vmem:[#allocation8 + $0x3e4] sm:$0xf] }
  0x80   :  { %2243 = vmatpush.bf16.msrb.mxu0 %v3850_v37  ;;  %2256 = vmatpush.bf16.msrb.mxu1 %v3978_v41  ;;  %v3753_v37 = vld [vmem:[#allocation8 + $0x420] sm:$0xf]  ;;  %v4606_v41 = vld [vmem:[#allocation8 + $0x52c] sm:$0xf0]  ;;  %v4026_v45 = vor.u32 %v4642_v43, %v4025_v48  ;;  %v3598_v43 = vor.u32 %v4532_v31, %v3595_v32  ;;  %v4444_v31 = vld [vmem:[#allocation8 + $0x24] sm:$0xf] }
  0x81   :  { %v3754_v39 = vor.u32 %v4574_v38, %v3753_v37  ;;  %v3882_v42 = vor.u32 %v4606_v41, %v3881_v40  ;;  %v4674_v46 = vld [vmem:[#allocation8 + $0x74c] sm:$0xf0]  ;;  %v4121_v0 = vld [vmem:[#allocation8 + $0x700] sm:$0xf]  ;;  %v3723_v37 = vld [vmem:[#allocation8 + $0x3f0] sm:$0xf0] }
  0x82   :  { %2269 = vmatpush.bf16.msrb.mxu2 %v4106_v49  ;;  %2282 = vmatpush.bf16.msrb.mxu3 %v4234_v51  ;;  %v4154_v47 = vor.u32 %v4674_v46, %v4153_v44  ;;  %v3737_v49 = vld [vmem:[#allocation8 + $0x400] sm:$0xf]  ;;  %v4602_v53 = vld [vmem:[#allocation8 + $0x50c] sm:$0xf0]  ;;  %v4460_v38 = vld [vmem:[#allocation8 + $0xa4] sm:$0xf] }
  0x83   :  { %v3865_v51 = vld [vmem:[#allocation8 + $0x500] sm:$0xf]  ;;  %v4638_v56 = vld [vmem:[#allocation8 + $0x62c] sm:$0xf0]  ;;  %v4492_v41 = vld [vmem:[#allocation8 + $0x1a4] sm:$0xf] }
  0x84   :  { %2244 = vmatpush.bf16.msrb.mxu0 %v3834_v50  ;;  %2257 = vmatpush.bf16.msrb.mxu1 %v3962_v55  ;;  %v4570_v50 = vld [vmem:[#allocation8 + $0x40c] sm:$0xf0]  ;;  %v3866_v54 = vor.u32 %v4602_v53, %v3865_v51  ;;  %v4009_v55 = vld [vmem:[#allocation8 + $0x620] sm:$0xf]  ;;  %v3707_v53 = vld [vmem:[#allocation8 + $0x3d0] sm:$0xf0] }
  0x85   :  { %v3738_v52 = vor.u32 %v4570_v50, %v3737_v49  ;;  %v4010_v57 = vor.u32 %v4638_v56, %v4009_v55  ;;  %v4670_v59 = vld [vmem:[#allocation8 + $0x72c] sm:$0xf0]  ;;  %v3579_v49 = vld [vmem:[#allocation8 + $0x2d0] sm:$0xf0]  ;;  %v4560_v50 = vld [vmem:[#allocation8 + $0x3c4] sm:$0xf] }
  0x86   :  { %2270 = vmatpush.bf16.msrb.mxu2 %v4090_v61  ;;  %2283 = vmatpush.bf16.msrb.mxu3 %v4218_v63  ;;  %v4138_v60 = vor.u32 %v4670_v59, %v4137_v58  ;;  %v3993_v61 = vld [vmem:[#allocation8 + $0x600] sm:$0xf]  ;;  %v4666_v1 = vld [vmem:[#allocation8 + $0x70c] sm:$0xf0]  ;;  %v3291_v55 = vld [vmem:[#allocation8 + $0x90] sm:$0xf0] }
  0x87   :  { %v4122_v2 = vor.u32 %v4666_v1, %v4121_v0  ;;  %v4488_v56 = vld [vmem:[#allocation8 + $0x184] sm:$0xf]  ;;  %v3563_v0 = vld [vmem:[#allocation8 + $0x2b0] sm:$0xf0] }
  0x88   :  { %2245 = vmatpush.bf16.msrb.mxu0 %v3818_v62  ;;  %2258 = vmatpush.bf16.msrb.mxu1 %v3946_v3  ;;  %v4634_v62 = vld [vmem:[#allocation8 + $0x60c] sm:$0xf0]  ;;  %v4988_v3 = vld [vmem:[#allocation7] sm:$0xff]  ;;  %v4556_v1 = vld [vmem:[#allocation8 + $0x3a4] sm:$0xf] }
  0x89   :  { %v3994_v63 = vor.u32 %v4634_v62, %v3993_v61  ;;  %v189_v4 = vperm.slane %v4988_v3, 0  ;;  %v190_v5 = vperm.slane %v4988_v3, 1  ;;  %v191_v16 = vperm.slane %v4988_v3, 2  ;;  %v3243_v32 = vld [vmem:[#allocation8 + $0x30] sm:$0xf0] }
  0x8a   :  { %2271 = vmatpush.bf16.msrb.mxu2 %v4074_v9  ;;  %2284 = vmatpush.bf16.msrb.mxu3 %v4202_v11  ;;  %v4468_v9 = vld [vmem:[#allocation8 + $0xe4] sm:$0xf]  ;;  %v192_v19 = vperm.slane %v4988_v3, 3  ;;  %v3710_v61 = vor.u32 %v4560_v50, %v3707_v53  ;;  %v3355_v53 = vld [vmem:[#allocation8 + $0x110] sm:$0xf0] }
  0x8c   :  { %2246 = vmatpush.bf16.msrb.mxu0 %v3802_v10  ;;  %2259 = vmatpush.bf16.msrb.mxu1 %v3930_v15  ;;  %v3339_v10 = vld [vmem:[#allocation8 + $0xf0] sm:$0xf0] }
  0x8d   :  { %v3342_v17 = vor.u32 %v4468_v9, %v3339_v10 }
  0x8e   :  { %2272 = vmatpush.bf16.msrb.mxu2 %v4058_v21  ;;  %2285 = vmatpush.bf16.msrb.mxu3 %v4186_v23  ;;  %v4464_v21 = vld [vmem:[#allocation8 + $0xc4] sm:$0xf] }
  0x90   :  { %2247 = vmatpush.bf16.msrb.mxu0 %v3786_v22  ;;  %2260 = vmatpush.bf16.msrb.mxu1 %v3914_v24  ;;  %v3323_v22 = vld [vmem:[#allocation8 + $0xd0] sm:$0xf0]  ;;  %v4496_v24 = vld [vmem:[#allocation8 + $0x1c4] sm:$0xf] }
  0x92   :  { %2273 = vmatpush.bf16.msrb.mxu2 %v4042_v34  ;;  %2286 = vmatpush.bf16.msrb.mxu3 %v4170_v36  ;;  %v3454_v36 = vor.u32 %v4496_v24, %v3451_v25 }
  0x94   :  { %2248 = vmatpush.bf16.msrb.mxu0 %v3770_v29  ;;  %2261 = vmatpush.bf16.msrb.mxu1 %v3898_v30  ;;  %v3326_v30 = vor.u32 %v4464_v21, %v3323_v22  ;;  %v3387_v21 = vld [vmem:[#allocation8 + $0x150] sm:$0xf0]  ;;  %v3550_v22 = vor.u32 %v4520_v12, %v3547_v13  ;;  %v4592_v13 = vld [vmem:[#allocation8 + $0x4c4] sm:$0xf] }
  0x96   :  { %2274 = vmatpush.bf16.msrb.mxu2 %v4026_v45  ;;  %2287 = vmatpush.bf16.msrb.mxu3 %v4154_v47  ;;  %v3726_v45 = vor.u32 %v4564_v33, %v3723_v37  ;;  %v4528_v47 = vld [vmem:[#allocation8 + $0x2c4] sm:$0xf]  ;;  %v193_v33 = vperm.slane %v4988_v3, 4 }
  0x97   :  { %v3582_v59 = vor.u32 %v4528_v47, %v3579_v49  ;;  %v3227_v47 = vld [vmem:[#allocation8 + $0x10] sm:$0xf0] }
  0x98   :  { %2249 = vmatpush.bf16.msrb.mxu0 %v3754_v39  ;;  %2262 = vmatpush.bf16.msrb.mxu1 %v3882_v42  ;;  %v3307_v39 = vld [vmem:[#allocation8 + $0xb0] sm:$0xf0] }
  0x99   :  { %v3435_v42 = vld [vmem:[#allocation8 + $0x1b0] sm:$0xf0]  ;;  %v3310_v46 = vor.u32 %v4460_v38, %v3307_v39  ;;  %v3246_v39 = vor.u32 %v4444_v31, %v3243_v32  ;;  %v4692_v32 = vld [vmem:[#allocation8 + $0x7e4] sm:$0xf] }
  0x9a   :  { %2275 = vmatpush.bf16.msrb.mxu2 %v4010_v57  ;;  %2288 = vmatpush.bf16.msrb.mxu3 %v4138_v60  ;;  %v3419_v57 = vld [vmem:[#allocation8 + $0x190] sm:$0xf0] }
  0x9b   :  { %v4107_v31 = vld [vmem:[#allocation8 + $0x6f0] sm:$0xf0] }
  0x9c   :  { %2250 = vmatpush.bf16.msrb.mxu0 %v3738_v52  ;;  %2263 = vmatpush.bf16.msrb.mxu1 %v3866_v54  ;;  %v3438_v52 = vor.u32 %v4492_v41, %v3435_v42  ;;  %v4456_v54 = vld [vmem:[#allocation8 + $0x84] sm:$0xf]  ;;  %v3515_v41 = vld [vmem:[#allocation8 + $0x250] sm:$0xf0] }
  0x9d   :  { %v3294_v62 = vor.u32 %v4456_v54, %v3291_v55  ;;  %v4544_v42 = vld [vmem:[#allocation8 + $0x344] sm:$0xf] }
  0x9e   :  { %2276 = vmatpush.bf16.msrb.mxu2 %v3994_v63  ;;  %2289 = vmatpush.bf16.msrb.mxu3 %v4122_v2  ;;  %v4524_v63 = vld [vmem:[#allocation8 + $0x2a4] sm:$0xf]  ;;  %v3422_v2 = vor.u32 %v4488_v56, %v3419_v57  ;;  %v3851_v57 = vld [vmem:[#allocation8 + $0x4f0] sm:$0xf0] }
  0x9f   :  { %v3566_v9 = vor.u32 %v4524_v63, %v3563_v0  ;;  %v4596_v54 = vld [vmem:[#allocation8 + $0x4e4] sm:$0xf]  ;;  %v3499_v0 = vld [vmem:[#allocation8 + $0x230] sm:$0xf0] }
  0xa0   :  { %v4508_v63 = vld [vmem:[#allocation8 + $0x224] sm:$0xf] }
  0xa1   :  { %v3502_v12 = vor.u32 %v4508_v63, %v3499_v0  ;;  %v4652_v0 = vld [vmem:[#allocation8 + $0x6a4] sm:$0xf] }
  0xbc   :  { %v534_v6 = vpop.f32.mrf.mxu0  ;;  %v547_v8 = vpop.f32.mrf.mxu1 }
  0xbd   :  { %v535_v7 = vadd.f32 %v534_v6, %v189_v4  ;;  %v548_v11 = vadd.f32 %v547_v8, %v190_v5  ;;  %v3691_v4 = vld [vmem:[#allocation8 + $0x3b0] sm:$0xf0]  ;;  %v4452_v5 = vld [vmem:[#allocation8 + $0x64] sm:$0xf] }
  0xbe   :  { %v3275_v6 = vld [vmem:[#allocation8 + $0x70] sm:$0xf0]  ;;  %v3694_v10 = vor.u32 %v4556_v1, %v3691_v4 }
  0xbf   :  { %v629_v14 = vmax.f32 %v535_v7, 0.0  ;;  %v630_v15 = vmax.f32 %v548_v11, 0.0  ;;  %v4484_v7 = vld [vmem:[#allocation8 + $0x164] sm:$0xf]  ;;  %v3403_v8 = vld [vmem:[#allocation8 + $0x170] sm:$0xf0]  ;;  %v3278_v11 = vor.u32 %v4452_v5, %v3275_v6 }
  0xc0   :  { %v4540_v5 = vld [vmem:[#allocation8 + $0x324] sm:$0xf]  ;;  %v3627_v6 = vld [vmem:[#allocation8 + $0x330] sm:$0xf0] }
  0xc1   :  { %v4993_v18 = vpack.c.bf16 %v629_v14, %v629_v14  ;;  %v4996_v23 = vpack.c.bf16 %v630_v15, %v630_v15  ;;  %v4552_v14 = vld [vmem:[#allocation8 + $0x384] sm:$0xf]  ;;  %v3406_v15 = vor.u32 %v4484_v7, %v3403_v8  ;;  %v196_v8 = vperm.slane %v4988_v3, 7 }
  0xc3   :  { %2199 = vmatmul.bf16.vlgmr.msra.gmra.mxu0 %v4993_v18  ;;  %2212 = vmatmul.bf16.vlgmr.msra.gmra.mxu1 %v4996_v23 }
  0xc4   :  { %v573_v28 = vpop.f32.mrf.mxu3  ;;  %2295 = vmatpush.bf16.msra.mxu0 %v3342_v17  ;;  %v536_v29 = vpop.f32.mrf.mxu0  ;;  %2308 = vmatpush.bf16.msra.mxu1 %v3470_v20  ;;  %v4448_v17 = vld [vmem:[#allocation8 + $0x44] sm:$0xf] }
  0xc5   :  { %v560_v26 = vpop.f32.mrf.mxu2  ;;  %v574_v34 = vadd.f32 %v573_v28, %v192_v19  ;;  %v549_v35 = vpop.f32.mrf.mxu1  ;;  %v3259_v19 = vld [vmem:[#allocation8 + $0x50] sm:$0xf0]  ;;  %v4480_v20 = vld [vmem:[#allocation8 + $0x144] sm:$0xf] }
  0xc6   :  { %v561_v27 = vadd.f32 %v560_v26, %v191_v16  ;;  %v3675_v16 = vld [vmem:[#allocation8 + $0x390] sm:$0xf0]  ;;  %v3262_v25 = vor.u32 %v4448_v17, %v3259_v19  ;;  %v4516_v26 = vld [vmem:[#allocation8 + $0x264] sm:$0xf]  ;;  %v3390_v29 = vor.u32 %v4480_v20, %v3387_v21  ;;  %v3630_v17 = vor.u32 %v4540_v5, %v3627_v6 }
  0xc7   :  { %v632_v48 = vmax.f32 %v574_v34, 0.0  ;;  %v3678_v24 = vor.u32 %v4552_v14, %v3675_v16  ;;  %v4548_v28 = vld [vmem:[#allocation8 + $0x364] sm:$0xf]  ;;  %v3371_v35 = vld [vmem:[#allocation8 + $0x130] sm:$0xf0] }
  0xc8   :  { %v631_v40 = vmax.f32 %v561_v27, 0.0  ;;  %2296 = vmatpush.bf16.msra.mxu0 %v3326_v30  ;;  %2309 = vmatpush.bf16.msra.mxu1 %v3454_v36  ;;  %v3531_v27 = vld [vmem:[#allocation8 + $0x270] sm:$0xf0]  ;;  %v4476_v34 = vld [vmem:[#allocation8 + $0x124] sm:$0xf]  ;;  %v194_v36 = vperm.slane %v4988_v3, 5 }
  0xc9   :  { %v5002_v51 = vpack.c.bf16 %v632_v48, %v632_v48  ;;  %v3659_v30 = vld [vmem:[#allocation8 + $0x370] sm:$0xf0]  ;;  %v3534_v37 = vor.u32 %v4516_v26, %v3531_v27  ;;  %v4504_v20 = vld [vmem:[#allocation8 + $0x204] sm:$0xf] }
  0xca   :  { %v5000_v44 = vpack.c.bf16 %v631_v40, %v631_v40  ;;  %v3662_v38 = vor.u32 %v4548_v28, %v3659_v30  ;;  %v4512_v40 = vld [vmem:[#allocation8 + $0x244] sm:$0xf]  ;;  %v3835_v14 = vld [vmem:[#allocation8 + $0x4d0] sm:$0xf0] }
  0xcb   :  { %2238 = vmatmul.bf16.vlgmr.msra.gmra.mxu3 %v5002_v51  ;;  %v3518_v56 = vor.u32 %v4512_v40, %v3515_v41  ;;  %v3963_v19 = vld [vmem:[#allocation8 + $0x5d0] sm:$0xf0]  ;;  %v4660_v27 = vld [vmem:[#allocation8 + $0x6e4] sm:$0xf]  ;;  %v3838_v30 = vor.u32 %v4592_v13, %v3835_v14 }
  0xcc   :  { %2225 = vmatmul.bf16.vlgmr.msra.gmra.mxu2 %v5000_v44  ;;  %2334 = vmatpush.bf16.msra.mxu3 %v3726_v45  ;;  %v575_v60 = vpop.f32.mrf.mxu3  ;;  %v3643_v45 = vld [vmem:[#allocation8 + $0x350] sm:$0xf0]  ;;  %v4620_v41 = vld [vmem:[#allocation8 + $0x5a4] sm:$0xf] }
  0xcd   :  { %2321 = vmatpush.bf16.msra.mxu2 %v3598_v43  ;;  %v562_v58 = vpop.f32.mrf.mxu2  ;;  %2297 = vmatpush.bf16.msra.mxu0 %v3310_v46  ;;  %v3374_v43 = vor.u32 %v4476_v34, %v3371_v35  ;;  %v4440_v46 = vld [vmem:[#allocation8 + $0x4] sm:$0xf]  ;;  %v3483_v21 = vld [vmem:[#allocation8 + $0x210] sm:$0xf0] }
  0xce   :  { %2310 = vmatpush.bf16.msra.mxu1 %v3438_v52  ;;  %v4472_v52 = vld [vmem:[#allocation8 + $0x104] sm:$0xf]  ;;  %v3611_v26 = vld [vmem:[#allocation8 + $0x310] sm:$0xf0] }
  0xcf   :  { %v4628_v58 = vld [vmem:[#allocation8 + $0x5e4] sm:$0xf]  ;;  %v3358_v4 = vor.u32 %v4472_v52, %v3355_v53  ;;  %v4203_v5 = vld [vmem:[#allocation8 + $0x7b0] sm:$0xf0] }
  0xd0   :  { %2335 = vmatpush.bf16.msra.mxu3 %v3710_v61  ;;  %v3646_v61 = vor.u32 %v4544_v42, %v3643_v45  ;;  %v3947_v42 = vld [vmem:[#allocation8 + $0x5b0] sm:$0xf0]  ;;  %v4688_v52 = vld [vmem:[#allocation8 + $0x7c4] sm:$0xf] }
  0xd1   :  { %2322 = vmatpush.bf16.msra.mxu2 %v3582_v59  ;;  %2298 = vmatpush.bf16.msra.mxu0 %v3294_v62  ;;  %v3979_v59 = vld [vmem:[#allocation8 + $0x5f0] sm:$0xf0]  ;;  %v3230_v62 = vor.u32 %v4440_v46, %v3227_v47  ;;  %v3950_v53 = vor.u32 %v4620_v41, %v3947_v42  ;;  %v4580_v6 = vld [vmem:[#allocation8 + $0x464] sm:$0xf] }
  0xd2   :  { %2311 = vmatpush.bf16.msra.mxu1 %v3422_v2  ;;  %v195_v2 = vperm.slane %v4988_v3, 6  ;;  %v4648_v14 = vld [vmem:[#allocation8 + $0x684] sm:$0xf] }
  0xd3   :  { %v4672_v41 = vld [vmem:[#allocation8 + $0x744] sm:$0xf] }
  0xd4   :  { %2336 = vmatpush.bf16.msra.mxu3 %v3694_v10 }
  0xd5   :  { %2323 = vmatpush.bf16.msra.mxu2 %v3566_v9  ;;  %2299 = vmatpush.bf16.msra.mxu0 %v3278_v11  ;;  %v3854_v9 = vor.u32 %v4596_v54, %v3851_v57  ;;  %v3982_v11 = vor.u32 %v4628_v58, %v3979_v59  ;;  %v4219_v54 = vld [vmem:[#allocation8 + $0x7d0] sm:$0xf0]  ;;  %v4616_v58 = vld [vmem:[#allocation8 + $0x584] sm:$0xf] }
  0xd6   :  { %2312 = vmatpush.bf16.msra.mxu1 %v3406_v15  ;;  %v4624_v15 = vld [vmem:[#allocation8 + $0x5c4] sm:$0xf]  ;;  %v3931_v59 = vld [vmem:[#allocation8 + $0x590] sm:$0xf0] }
  0xd7   :  { %v3966_v35 = vor.u32 %v4624_v15, %v3963_v19  ;;  %v4059_v15 = vld [vmem:[#allocation8 + $0x690] sm:$0xf0]  ;;  %v4680_v19 = vld [vmem:[#allocation8 + $0x784] sm:$0xf] }
  0xd8   :  { %2337 = vmatpush.bf16.msra.mxu3 %v3678_v24 }
  0xd9   :  { %2324 = vmatpush.bf16.msra.mxu2 %v3550_v22  ;;  %2300 = vmatpush.bf16.msra.mxu0 %v3262_v25  ;;  %v4536_v25 = vld [vmem:[#allocation8 + $0x304] sm:$0xf] }
  0xda   :  { %2313 = vmatpush.bf16.msra.mxu1 %v3390_v29  ;;  %v3614_v40 = vor.u32 %v4536_v25, %v3611_v26  ;;  %v4062_v25 = vor.u32 %v4648_v14, %v4059_v15  ;;  %v4664_v14 = vld [vmem:[#allocation8 + $0x704] sm:$0xf]  ;;  %v4123_v15 = vld [vmem:[#allocation8 + $0x710] sm:$0xf0] }
  0xdc   :  { %v586_v48 = vpop.f32.mrf.mxu0  ;;  %v599_v50 = vpop.f32.mrf.mxu1  ;;  %2338 = vmatpush.bf16.msra.mxu3 %v3662_v38  ;;  %v3819_v38 = vld [vmem:[#allocation8 + $0x4b0] sm:$0xf0] }
  0xdd   :  { %v587_v49 = vadd.f32 %v586_v48, %v193_v33  ;;  %v600_v55 = vadd.f32 %v599_v50, %v194_v36  ;;  %2325 = vmatpush.bf16.msra.mxu2 %v3534_v37  ;;  %2301 = vmatpush.bf16.msra.mxu0 %v3246_v39  ;;  %v4235_v33 = vld [vmem:[#allocation8 + $0x7f0] sm:$0xf0]  ;;  %v3486_v36 = vor.u32 %v4504_v20, %v3483_v21  ;;  %v4588_v37 = vld [vmem:[#allocation8 + $0x4a4] sm:$0xf] }
  0xde   :  { %2314 = vmatpush.bf16.msra.mxu1 %v3374_v43  ;;  %v4110_v43 = vor.u32 %v4660_v27, %v4107_v31  ;;  %v4238_v46 = vor.u32 %v4692_v32, %v4235_v33  ;;  %v3822_v47 = vor.u32 %v4588_v37, %v3819_v38  ;;  %v4091_v50 = vld [vmem:[#allocation8 + $0x6d0] sm:$0xf0]  ;;  %v4576_v21 = vld [vmem:[#allocation8 + $0x444] sm:$0xf] }
  0xdf   :  { %v633_v60 = vmax.f32 %v587_v49, 0.0  ;;  %v634_v1 = vmax.f32 %v600_v55, 0.0  ;;  %v4656_v49 = vld [vmem:[#allocation8 + $0x6c4] sm:$0xf]  ;;  %v4187_v20 = vld [vmem:[#allocation8 + $0x790] sm:$0xf0] }
  0xe0   :  { %2339 = vmatpush.bf16.msra.mxu3 %v3646_v61  ;;  %v4584_v55 = vld [vmem:[#allocation8 + $0x484] sm:$0xf]  ;;  %v4094_v61 = vor.u32 %v4656_v49, %v4091_v50  ;;  %v4190_v26 = vor.u32 %v4680_v19, %v4187_v20  ;;  %v4171_v32 = vld [vmem:[#allocation8 + $0x770] sm:$0xf0] }
  0xe1   :  { %v5009_v7 = vpack.c.bf16 %v633_v60, %v633_v60  ;;  %v5012_v10 = vpack.c.bf16 %v634_v1, %v634_v1  ;;  %2326 = vmatpush.bf16.msra.mxu2 %v3518_v56  ;;  %2302 = vmatpush.bf16.msra.mxu0 %v3230_v62  ;;  %v3803_v56 = vld [vmem:[#allocation8 + $0x490] sm:$0xf0]  ;;  %v4222_v62 = vor.u32 %v4688_v52, %v4219_v54  ;;  %v4644_v27 = vld [vmem:[#allocation8 + $0x664] sm:$0xf] }
  0xe2   :  { %2315 = vmatpush.bf16.msra.mxu1 %v3358_v4  ;;  %v3806_v63 = vor.u32 %v4584_v55, %v3803_v56  ;;  %v4075_v1 = vld [vmem:[#allocation8 + $0x6b0] sm:$0xf0]  ;;  %v4684_v4 = vld [vmem:[#allocation8 + $0x7a4] sm:$0xf]  ;;  %v4471_v55 = vld [vmem:[#allocation8 + $0xf4] sm:$0xf0] }
  0xe3   :  { %2251 = vmatmul.bf16.vlgmr.msrb.gmra.mxu0 %v5009_v7  ;;  %2264 = vmatmul.bf16.vlgmr.msrb.gmra.mxu1 %v5012_v10  ;;  %v4206_v13 = vor.u32 %v4684_v4, %v4203_v5  ;;  %v4676_v31 = vld [vmem:[#allocation8 + $0x764] sm:$0xf]  ;;  %v3739_v49 = vld [vmem:[#allocation8 + $0x410] sm:$0xf0]  ;;  %v3473_v56 = vld [vmem:[#allocation8 + $0x1e8] sm:$0xf] }
  0xe4   :  { %v612_v16 = vpop.f32.mrf.mxu2  ;;  %v625_v24 = vpop.f32.mrf.mxu3  ;;  %2340 = vmatpush.bf16.msra.mxu3 %v3630_v17  ;;  %v4572_v33 = vld [vmem:[#allocation8 + $0x424] sm:$0xf]  ;;  %v4174_v38 = vor.u32 %v4676_v31, %v4171_v32  ;;  %v3867_v52 = vld [vmem:[#allocation8 + $0x510] sm:$0xf0]  ;;  %v3329_v4 = vld [vmem:[#allocation8 + $0xc8] sm:$0xf] }
  0xe5   :  { %v613_v22 = vadd.f32 %v612_v16, %v195_v2  ;;  %v588_v3 = vpop.f32.mrf.mxu0  ;;  %v626_v28 = vadd.f32 %v625_v24, %v196_v8  ;;  %2347 = vmatpush.bf16.msrb.mxu0 %v3854_v9  ;;  %v601_v29 = vpop.f32.mrf.mxu1  ;;  %2327 = vmatpush.bf16.msra.mxu2 %v3502_v12  ;;  %v3934_v2 = vor.u32 %v4616_v58, %v3931_v59  ;;  %v3787_v8 = vld [vmem:[#allocation8 + $0x470] sm:$0xf0]  ;;  %v4612_v9 = vld [vmem:[#allocation8 + $0x564] sm:$0xf]  ;;  %v3585_v31 = vld [vmem:[#allocation8 + $0x2c8] sm:$0xf] }
  0xe6   :  { %2360 = vmatpush.bf16.msrb.mxu1 %v3982_v11  ;;  %v3915_v11 = vld [vmem:[#allocation8 + $0x570] sm:$0xf0]  ;;  %v4078_v12 = vor.u32 %v4652_v0, %v4075_v1  ;;  %v3790_v16 = vor.u32 %v4580_v6, %v3787_v8  ;;  %v4608_v24 = vld [vmem:[#allocation8 + $0x544] sm:$0xf]  ;;  %v4467_v6 = vld [vmem:[#allocation8 + $0xd4] sm:$0xf0] }
  0xe7   :  { %v635_v34 = vmax.f32 %v613_v22, 0.0  ;;  %v636_v39 = vmax.f32 %v626_v28, 0.0  ;;  %v3918_v17 = vor.u32 %v4612_v9, %v3915_v11  ;;  %v3771_v22 = vld [vmem:[#allocation8 + $0x450] sm:$0xf0]  ;;  %v4600_v50 = vld [vmem:[#allocation8 + $0x504] sm:$0xf]  ;;  %v3330_v19 = vor.u32 %v4467_v6, %v3329_v4 }
  0xe8   :  { %2341 = vmatpush.bf16.msra.mxu3 %v3614_v40  ;;  %v3899_v3 = vld [vmem:[#allocation8 + $0x550] sm:$0xf0]  ;;  %v3774_v29 = vor.u32 %v4576_v21, %v3771_v22  ;;  %v4636_v59 = vld [vmem:[#allocation8 + $0x624] sm:$0xf]  ;;  %v3457_v8 = vld [vmem:[#allocation8 + $0x1c8] sm:$0xf] }
  0xe9   :  { %v5016_v48 = vpack.c.bf16 %v635_v34, %v635_v34  ;;  %v5018_v45 = vpack.c.bf16 %v636_v39, %v636_v39  ;;  %2348 = vmatpush.bf16.msrb.mxu0 %v3838_v30  ;;  %2328 = vmatpush.bf16.msra.mxu2 %v3486_v36  ;;  %v4043_v28 = vld [vmem:[#allocation8 + $0x670] sm:$0xf0]  ;;  %v3902_v30 = vor.u32 %v4608_v24, %v3899_v3  ;;  %v4640_v39 = vld [vmem:[#allocation8 + $0x644] sm:$0xf]  ;;  %v4499_v9 = vld [vmem:[#allocation8 + $0x1d4] sm:$0xf0] }
  0xea   :  { %2361 = vmatpush.bf16.msrb.mxu1 %v3966_v35  ;;  %v3755_v34 = vld [vmem:[#allocation8 + $0x430] sm:$0xf0]  ;;  %v4604_v35 = vld [vmem:[#allocation8 + $0x524] sm:$0xf]  ;;  %v4046_v37 = vor.u32 %v4644_v27, %v4043_v28  ;;  %v3458_v20 = vor.u32 %v4499_v9, %v3457_v8  ;;  %v3729_v21 = vld [vmem:[#allocation8 + $0x3e8] sm:$0xf]  ;;  %v4126_v28 = vor.u32 %v4664_v14, %v4123_v15 }
  0xeb   :  { %2277 = vmatmul.bf16.vlgmr.msrb.gmra.mxu2 %v5016_v48  ;;  %2290 = vmatmul.bf16.vlgmr.msrb.gmra.mxu3 %v5018_v45  ;;  %v3883_v36 = vld [vmem:[#allocation8 + $0x530] sm:$0xf0]  ;;  %v3758_v42 = vor.u32 %v4572_v33, %v3755_v34  ;;  %v4567_v22 = vld [vmem:[#allocation8 + $0x3f4] sm:$0xf0]  ;;  %v3313_v24 = vld [vmem:[#allocation8 + $0xa8] sm:$0xf] }
  0xec   :  { %v614_v57 = vpop.f32.mrf.mxu2  ;;  %v627_v60 = vpop.f32.mrf.mxu3  ;;  %2386 = vmatpush.bf16.msrb.mxu3 %v4238_v46  ;;  %v4027_v40 = vld [vmem:[#allocation8 + $0x650] sm:$0xf0]  ;;  %v4495_v27 = vld [vmem:[#allocation8 + $0x1b4] sm:$0xf0]  ;;  %v3393_v4 = vld [vmem:[#allocation8 + $0x148] sm:$0xf] }
  0xed   :  { %2373 = vmatpush.bf16.msrb.mxu2 %v4110_v43  ;;  %2349 = vmatpush.bf16.msrb.mxu0 %v3822_v47  ;;  %v3886_v43 = vor.u32 %v4604_v35, %v3883_v36  ;;  %v4155_v46 = vld [vmem:[#allocation8 + $0x750] sm:$0xf0]  ;;  %v4568_v47 = vld [vmem:[#allocation8 + $0x404] sm:$0xf]  ;;  %v4030_v54 = vor.u32 %v4640_v39, %v4027_v40  ;;  %v4503_v57 = vld [vmem:[#allocation8 + $0x1f4] sm:$0xf0] }
  0xee   :  { %2362 = vmatpush.bf16.msrb.mxu1 %v3950_v53  ;;  %v3345_v53 = vld [vmem:[#allocation8 + $0xe8] sm:$0xf]  ;;  %v4158_v58 = vor.u32 %v4672_v41, %v4155_v46  ;;  %v4011_v60 = vld [vmem:[#allocation8 + $0x630] sm:$0xf0]  ;;  %v4531_v32 = vld [vmem:[#allocation8 + $0x2d4] sm:$0xf0] }
  0xef   :  { %v4139_v0 = vld [vmem:[#allocation8 + $0x730] sm:$0xf0]  ;;  %v3346_v1 = vor.u32 %v4471_v55, %v3345_v53  ;;  %v4014_v5 = vor.u32 %v4636_v59, %v4011_v60  ;;  %v3713_v35 = vld [vmem:[#allocation8 + $0x3c8] sm:$0xf]  ;;  %v4563_v36 = vld [vmem:[#allocation8 + $0x3d4] sm:$0xf0]  ;;  %v3586_v41 = vor.u32 %v4531_v32, %v3585_v31 }
  0xf0   :  { %2387 = vmatpush.bf16.msrb.mxu3 %v4222_v62  ;;  %v3870_v62 = vor.u32 %v4600_v50, %v3867_v52  ;;  %v3425_v39 = vld [vmem:[#allocation8 + $0x188] sm:$0xf]  ;;  %v4491_v40 = vld [vmem:[#allocation8 + $0x194] sm:$0xf0] }
  0xf1   :  { %2374 = vmatpush.bf16.msrb.mxu2 %v4094_v61  ;;  %2350 = vmatpush.bf16.msrb.mxu0 %v3806_v63  ;;  %v3742_v61 = vor.u32 %v4568_v47, %v3739_v49  ;;  %v4668_v63 = vld [vmem:[#allocation8 + $0x724] sm:$0xf]  ;;  %v4527_v46 = vld [vmem:[#allocation8 + $0x2b4] sm:$0xf0]  ;;  %v3426_v49 = vor.u32 %v4491_v40, %v3425_v39  ;;  %v3697_v50 = vld [vmem:[#allocation8 + $0x3a8] sm:$0xf] }
  0xf2   :  { %2363 = vmatpush.bf16.msrb.mxu1 %v3934_v2  ;;  %v3474_v2 = vor.u32 %v4503_v57, %v3473_v56  ;;  %v4142_v11 = vor.u32 %v4668_v63, %v4139_v0  ;;  %v4559_v52 = vld [vmem:[#allocation8 + $0x3b4] sm:$0xf0]  ;;  %v3281_v53 = vld [vmem:[#allocation8 + $0x68] sm:$0xf] }
  0xf3   :  { %2303 = vmatmul.bf16.vlgmr.msra.gmra.mxu0 %v4993_v18  ;;  %2316 = vmatmul.bf16.vlgmr.msra.gmra.mxu1 %v4996_v23  ;;  %v3409_v55 = vld [vmem:[#allocation8 + $0x168] sm:$0xf]  ;;  %v4487_v56 = vld [vmem:[#allocation8 + $0x174] sm:$0xf0] }
  0xf4   :  { %2388 = vmatpush.bf16.msrb.mxu3 %v4206_v13  ;;  %v3995_v13 = vld [vmem:[#allocation8 + $0x610] sm:$0xf0]  ;;  %v3553_v59 = vld [vmem:[#allocation8 + $0x288] sm:$0xf]  ;;  %v4523_v60 = vld [vmem:[#allocation8 + $0x294] sm:$0xf0] }
  0xf5   :  { %2375 = vmatpush.bf16.msrb.mxu2 %v4078_v12  ;;  %2351 = vmatpush.bf16.msrb.mxu0 %v3790_v16  ;;  %v4632_v12 = vld [vmem:[#allocation8 + $0x604] sm:$0xf]  ;;  %v3601_v16 = vld [vmem:[#allocation8 + $0x2e8] sm:$0xf]  ;;  %v4555_v0 = vld [vmem:[#allocation8 + $0x394] sm:$0xf0]  ;;  %v3554_v6 = vor.u32 %v4523_v60, %v3553_v59 }
  0xf6   :  { %2364 = vmatpush.bf16.msrb.mxu1 %v3918_v17  ;;  %v4535_v17 = vld [vmem:[#allocation8 + $0x2f4] sm:$0xf0]  ;;  %v3998_v3 = vor.u32 %v4632_v12, %v3995_v13  ;;  %v3681_v63 = vld [vmem:[#allocation8 + $0x388] sm:$0xf] }
  0xf7   :  { %v3682_v8 = vor.u32 %v4555_v0, %v3681_v63  ;;  %v3537_v9 = vld [vmem:[#allocation8 + $0x268] sm:$0xf]  ;;  %v4551_v15 = vld [vmem:[#allocation8 + $0x374] sm:$0xf0] }
  0xf8   :  { %2389 = vmatpush.bf16.msrb.mxu3 %v4190_v26  ;;  %v3441_v26 = vld [vmem:[#allocation8 + $0x1a8] sm:$0xf]  ;;  %v4475_v32 = vld [vmem:[#allocation8 + $0x114] sm:$0xf0] }
  0xf9   :  { %2376 = vmatpush.bf16.msrb.mxu2 %v4062_v25  ;;  %2352 = vmatpush.bf16.msrb.mxu0 %v3774_v29  ;;  %v4463_v25 = vld [vmem:[#allocation8 + $0xb4] sm:$0xf0]  ;;  %v3602_v29 = vor.u32 %v4535_v17, %v3601_v16  ;;  %v3442_v34 = vor.u32 %v4495_v27, %v3441_v26  ;;  %v3665_v14 = vld [vmem:[#allocation8 + $0x368] sm:$0xf] }
  0xfa   :  { %2365 = vmatpush.bf16.msrb.mxu1 %v3902_v30  ;;  %v3730_v30 = vor.u32 %v4567_v22, %v3729_v21  ;;  %v3314_v33 = vor.u32 %v4463_v25, %v3313_v24  ;;  %v3249_v16 = vld [vmem:[#allocation8 + $0x28] sm:$0xf]  ;;  %v4447_v17 = vld [vmem:[#allocation8 + $0x34] sm:$0xf0]  ;;  %v3666_v22 = vor.u32 %v4551_v15, %v3665_v14 }
  0xfb   :  { %2329 = vmatmul.bf16.vlgmr.msra.gmra.mxu2 %v5000_v44  ;;  %2342 = vmatmul.bf16.vlgmr.msra.gmra.mxu3 %v5002_v51  ;;  %v3521_v24 = vld [vmem:[#allocation8 + $0x248] sm:$0xf]  ;;  %v3250_v26 = vor.u32 %v4447_v17, %v3249_v16  ;;  %v4511_v40 = vld [vmem:[#allocation8 + $0x234] sm:$0xf0] }
  0xfc   :  { %2390 = vmatpush.bf16.msrb.mxu3 %v4174_v38  ;;  %v4459_v38 = vld [vmem:[#allocation8 + $0x94] sm:$0xf0]  ;;  %v3649_v25 = vld [vmem:[#allocation8 + $0x348] sm:$0xf] }
  0xfd   :  { %2377 = vmatpush.bf16.msrb.mxu2 %v4046_v37  ;;  %2353 = vmatpush.bf16.msrb.mxu0 %v3758_v42  ;;  %v3297_v37 = vld [vmem:[#allocation8 + $0x88] sm:$0xf]  ;;  %v3714_v42 = vor.u32 %v4563_v36, %v3713_v35  ;;  %v4599_v35 = vld [vmem:[#allocation8 + $0x4f4] sm:$0xf0] }
  0xfe   :  { %2366 = vmatpush.bf16.msrb.mxu1 %v3886_v43  ;;  %v3569_v43 = vld [vmem:[#allocation8 + $0x2a8] sm:$0xf]  ;;  %v3298_v47 = vor.u32 %v4459_v38, %v3297_v37  ;;  %v4631_v37 = vld [vmem:[#allocation8 + $0x5f4] sm:$0xf0] }
  0xff   :  { %v3570_v57 = vor.u32 %v4527_v46, %v3569_v43  ;;  %v3361_v31 = vld [vmem:[#allocation8 + $0x108] sm:$0xf]  ;;  %v4543_v46 = vld [vmem:[#allocation8 + $0x334] sm:$0xf0] }
 0x100   :  { %2391 = vmatpush.bf16.msrb.mxu3 %v4158_v58  ;;  %v3698_v58 = vor.u32 %v4559_v52, %v3697_v50  ;;  %v3985_v36 = vld [vmem:[#allocation8 + $0x5e8] sm:$0xf]  ;;  %v4539_v60 = vld [vmem:[#allocation8 + $0x314] sm:$0xf0] }
 0x101   :  { %2378 = vmatpush.bf16.msrb.mxu2 %v4030_v54  ;;  %2354 = vmatpush.bf16.msrb.mxu0 %v3742_v61  ;;  %v4455_v54 = vld [vmem:[#allocation8 + $0x74] sm:$0xf0]  ;;  %v3505_v39 = vld [vmem:[#allocation8 + $0x228] sm:$0xf] }
 0x102   :  { %2367 = vmatpush.bf16.msrb.mxu1 %v3870_v62  ;;  %v3282_v61 = vor.u32 %v4455_v54, %v3281_v53  ;;  %v3410_v62 = vor.u32 %v4487_v56, %v3409_v55  ;;  %v3633_v43 = vld [vmem:[#allocation8 + $0x328] sm:$0xf]  ;;  %v3506_v52 = vor.u32 %v4511_v40, %v3505_v39  ;;  %v4595_v53 = vld [vmem:[#allocation8 + $0x4d4] sm:$0xf0] }
 0x103   :  { %v3841_v50 = vld [vmem:[#allocation8 + $0x4c8] sm:$0xf]  ;;  %v4627_v55 = vld [vmem:[#allocation8 + $0x5d4] sm:$0xf0]  ;;  %v3634_v56 = vor.u32 %v4543_v46, %v3633_v43 }
 0x104   :  { %2392 = vmatpush.bf16.msrb.mxu3 %v4142_v11  ;;  %2355 = vmatmul.bf16.vlgmr.msrb.gmra.mxu0 %v5009_v7  ;;  %v4519_v11 = vld [vmem:[#allocation8 + $0x274] sm:$0xf0]  ;;  %v3969_v54 = vld [vmem:[#allocation8 + $0x5c8] sm:$0xf]  ;;  %v3842_v63 = vor.u32 %v4595_v53, %v3841_v50 }
 0x105   :  { %2399 = vmatpush.bf16.msra.mxu0 %v3346_v1  ;;  %2379 = vmatpush.bf16.msrb.mxu2 %v4014_v5  ;;  %v3265_v1 = vld [vmem:[#allocation8 + $0x48] sm:$0xf]  ;;  %v4483_v5 = vld [vmem:[#allocation8 + $0x154] sm:$0xf0]  ;;  %v3538_v21 = vor.u32 %v4519_v11, %v3537_v9  ;;  %v3970_v0 = vor.u32 %v4627_v55, %v3969_v54 }
 0x106   :  { %2412 = vmatpush.bf16.msra.mxu1 %v3474_v2  ;;  %v4451_v2 = vld [vmem:[#allocation8 + $0x54] sm:$0xf0]  ;;  %v3394_v13 = vor.u32 %v4483_v5, %v3393_v4  ;;  %v3617_v59 = vld [vmem:[#allocation8 + $0x308] sm:$0xf] }
 0x107   :  { %2368 = vmatmul.bf16.vlgmr.msrb.gmra.mxu1 %v5012_v10  ;;  %v3266_v12 = vor.u32 %v4451_v2, %v3265_v1  ;;  %v4241_v1 = vld [vmem:[#allocation8 + $0x7e8] sm:$0xf]  ;;  %v4695_v2 = vld [vmem:[#allocation8 + $0x7f4] sm:$0xf0] }
 0x108   :  { %2393 = vmatpush.bf16.msrb.mxu3 %v4126_v28  ;;  %v4547_v28 = vld [vmem:[#allocation8 + $0x354] sm:$0xf0]  ;;  %v3825_v5 = vld [vmem:[#allocation8 + $0x4a8] sm:$0xf] }
 0x109   :  { %2400 = vmatpush.bf16.msra.mxu0 %v3330_v19  ;;  %2380 = vmatpush.bf16.msrb.mxu2 %v3998_v3  ;;  %v3377_v19 = vld [vmem:[#allocation8 + $0x128] sm:$0xf]  ;;  %v4515_v3 = vld [vmem:[#allocation8 + $0x254] sm:$0xf0]  ;;  %v3650_v38 = vor.u32 %v4547_v28, %v3649_v25 }
 0x10a   :  { %2413 = vmatpush.bf16.msra.mxu1 %v3458_v20  ;;  %v4479_v20 = vld [vmem:[#allocation8 + $0x134] sm:$0xf0]  ;;  %v3953_v11 = vld [vmem:[#allocation8 + $0x5a8] sm:$0xf] }
 0x10b   :  { %2394 = vmatmul.bf16.vlgmr.msrb.gmra.mxu3 %v5018_v45  ;;  %v3378_v27 = vor.u32 %v4479_v20, %v3377_v19  ;;  %v4097_v14 = vld [vmem:[#allocation8 + $0x6c8] sm:$0xf]  ;;  %v4659_v15 = vld [vmem:[#allocation8 + $0x6d4] sm:$0xf0] }
 0x10c   :  { %2438 = vmatpush.bf16.msra.mxu3 %v3730_v30  ;;  %2381 = vmatmul.bf16.vlgmr.msrb.gmra.mxu2 %v5016_v48  ;;  %v4443_v30 = vld [vmem:[#allocation8 + $0x14] sm:$0xf0]  ;;  %v4225_v17 = vld [vmem:[#allocation8 + $0x7c8] sm:$0xf] }
 0x10d   :  { %2425 = vmatpush.bf16.msra.mxu2 %v3602_v29  ;;  %2401 = vmatpush.bf16.msra.mxu0 %v3314_v33  ;;  %v3233_v29 = vld [vmem:[#allocation8 + $0x8] sm:$0xf]  ;;  %v4691_v19 = vld [vmem:[#allocation8 + $0x7d4] sm:$0xf0] }
 0x10e   :  { %2414 = vmatpush.bf16.msra.mxu1 %v3442_v34  ;;  %v3857_v33 = vld [vmem:[#allocation8 + $0x4e8] sm:$0xf]  ;;  %v3522_v34 = vor.u32 %v4515_v3, %v3521_v24  ;;  %v4098_v24 = vor.u32 %v4659_v15, %v4097_v14  ;;  %v4619_v25 = vld [vmem:[#allocation8 + $0x594] sm:$0xf0] }
 0x10f   :  { %v3937_v3 = vld [vmem:[#allocation8 + $0x588] sm:$0xf]  ;;  %v4655_v28 = vld [vmem:[#allocation8 + $0x6b4] sm:$0xf0] }
 0x110   :  { %2439 = vmatpush.bf16.msra.mxu3 %v3714_v42  ;;  %v3362_v42 = vor.u32 %v4475_v32, %v3361_v31  ;;  %v4687_v31 = vld [vmem:[#allocation8 + $0x7b4] sm:$0xf0]  ;;  %v3938_v32 = vor.u32 %v4619_v25, %v3937_v3  ;;  %v4065_v39 = vld [vmem:[#allocation8 + $0x688] sm:$0xf] }
 0x111   :  { %2426 = vmatpush.bf16.msra.mxu2 %v3586_v41  ;;  %2402 = vmatpush.bf16.msra.mxu0 %v3298_v47  ;;  %v3234_v41 = vor.u32 %v4443_v30, %v3233_v29  ;;  %v3858_v47 = vor.u32 %v4599_v35, %v3857_v33  ;;  %v4209_v30 = vld [vmem:[#allocation8 + $0x7a8] sm:$0xf]  ;;  %v4651_v40 = vld [vmem:[#allocation8 + $0x694] sm:$0xf0] }
 0x112   :  { %2415 = vmatpush.bf16.msra.mxu1 %v3426_v49  ;;  %v3986_v49 = vor.u32 %v4631_v37, %v3985_v36  ;;  %v3793_v33 = vld [vmem:[#allocation8 + $0x468] sm:$0xf]  ;;  %v4615_v37 = vld [vmem:[#allocation8 + $0x574] sm:$0xf0]  ;;  %v4066_v50 = vor.u32 %v4651_v40, %v4065_v39 }
 0x113   :  { %v3921_v36 = vld [vmem:[#allocation8 + $0x568] sm:$0xf]  ;;  %v4683_v43 = vld [vmem:[#allocation8 + $0x794] sm:$0xf0] }
 0x114   :  { %2440 = vmatpush.bf16.msra.mxu3 %v3698_v58  ;;  %v4507_v58 = vld [vmem:[#allocation8 + $0x214] sm:$0xf0]  ;;  %v3922_v46 = vor.u32 %v4615_v37, %v3921_v36  ;;  %v4049_v55 = vld [vmem:[#allocation8 + $0x668] sm:$0xf] }
 0x115   :  { %2427 = vmatpush.bf16.msra.mxu2 %v3570_v57  ;;  %2403 = vmatpush.bf16.msra.mxu0 %v3282_v61  ;;  %v3489_v57 = vld [vmem:[#allocation8 + $0x208] sm:$0xf]  ;;  %v4611_v53 = vld [vmem:[#allocation8 + $0x554] sm:$0xf0] }
 0x116   :  { %2416 = vmatpush.bf16.msra.mxu1 %v3410_v62  ;;  %v4113_v61 = vld [vmem:[#allocation8 + $0x6e8] sm:$0xf]  ;;  %v4663_v62 = vld [vmem:[#allocation8 + $0x6f4] sm:$0xf0]  ;;  %v3490_v4 = vor.u32 %v4507_v58, %v3489_v57 }
 0x117   :  { %v4114_v9 = vor.u32 %v4663_v62, %v4113_v61  ;;  %v4177_v58 = vld [vmem:[#allocation8 + $0x768] sm:$0xf]  ;;  %v4575_v62 = vld [vmem:[#allocation8 + $0x434] sm:$0xf0] }
 0x118   :  { %2441 = vmatpush.bf16.msra.mxu3 %v3682_v8  ;;  %v3618_v8 = vor.u32 %v4539_v60, %v3617_v59  ;;  %v4679_v59 = vld [vmem:[#allocation8 + $0x774] sm:$0xf0]  ;;  %v3761_v61 = vld [vmem:[#allocation8 + $0x428] sm:$0xf] }
 0x119   :  { %2428 = vmatpush.bf16.msra.mxu2 %v3554_v6  ;;  %2404 = vmatpush.bf16.msra.mxu0 %v3266_v12  ;;  %v4591_v6 = vld [vmem:[#allocation8 + $0x4b4] sm:$0xf0]  ;;  %v3873_v14 = vld [vmem:[#allocation8 + $0x508] sm:$0xf] }
 0x11a   :  { %2417 = vmatpush.bf16.msra.mxu1 %v3394_v13  ;;  %v4623_v12 = vld [vmem:[#allocation8 + $0x5b4] sm:$0xf0]  ;;  %v4242_v13 = vor.u32 %v4695_v2, %v4241_v1  ;;  %v3826_v16 = vor.u32 %v4591_v6, %v3825_v5  ;;  %v4178_v2 = vor.u32 %v4679_v59, %v4177_v58  ;;  %v3762_v6 = vor.u32 %v4575_v62, %v3761_v61  ;;  %v4001_v37 = vld [vmem:[#allocation8 + $0x608] sm:$0xf]  ;;  %v4529_v59 = vld [vmem:[#allocation8 + $0x2cc] sm:$0xf] }
 0x11b   :  { %v3954_v20 = vor.u32 %v4623_v12, %v3953_v11  ;;  %v4607_v1 = vld [vmem:[#allocation8 + $0x534] sm:$0xf0]  ;;  %v3745_v11 = vld [vmem:[#allocation8 + $0x408] sm:$0xf]  ;;  %v4561_v62 = vld [vmem:[#allocation8 + $0x3cc] sm:$0xf] }
 0x11c   :  { %2442 = vmatpush.bf16.msra.mxu3 %v3666_v22  ;;  %v4587_v22 = vld [vmem:[#allocation8 + $0x494] sm:$0xf0]  ;;  %v4129_v39 = vld [vmem:[#allocation8 + $0x708] sm:$0xf] }
 0x11d   :  { %2429 = vmatpush.bf16.msra.mxu2 %v3538_v21  ;;  %2405 = vmatpush.bf16.msra.mxu0 %v3250_v26  ;;  %v3809_v21 = vld [vmem:[#allocation8 + $0x488] sm:$0xf]  ;;  %v4226_v26 = vor.u32 %v4691_v19, %v4225_v17  ;;  %v4643_v5 = vld [vmem:[#allocation8 + $0x654] sm:$0xf0]  ;;  %v4469_v17 = vld [vmem:[#allocation8 + $0xec] sm:$0xf] }
 0x11e   :  { %2418 = vmatpush.bf16.msra.mxu1 %v3378_v27  ;;  %v4081_v27 = vld [vmem:[#allocation8 + $0x6a8] sm:$0xf]  ;;  %v3810_v29 = vor.u32 %v4587_v22, %v3809_v21  ;;  %v4603_v15 = vld [vmem:[#allocation8 + $0x514] sm:$0xf0]  ;;  %v3347_v19 = vld [vmem:[#allocation8 + $0xf8] sm:$0xf0] }
 0x11f   :  { %v4082_v35 = vor.u32 %v4655_v28, %v4081_v27  ;;  %v3475_v22 = vld [vmem:[#allocation8 + $0x1f8] sm:$0xf0]  ;;  %v4639_v3 = vld [vmem:[#allocation8 + $0x634] sm:$0xf0]  ;;  %v3874_v28 = vor.u32 %v4603_v15, %v3873_v14  ;;  %v4557_v15 = vld [vmem:[#allocation8 + $0x3ac] sm:$0xf] }
 0x120   :  { %2443 = vmatpush.bf16.msra.mxu3 %v3650_v38  ;;  %v4210_v38 = vor.u32 %v4687_v31, %v4209_v30  ;;  %v4671_v27 = vld [vmem:[#allocation8 + $0x734] sm:$0xf0]  ;;  %v4465_v30 = vld [vmem:[#allocation8 + $0xcc] sm:$0xf] }
 0x121   :  { %2430 = vmatpush.bf16.msra.mxu2 %v3522_v34  ;;  %2406 = vmatpush.bf16.msra.mxu0 %v3234_v41  ;;  %v4583_v34 = vld [vmem:[#allocation8 + $0x474] sm:$0xf0] }
 0x122   :  { %2419 = vmatpush.bf16.msra.mxu1 %v3362_v42  ;;  %v3794_v41 = vor.u32 %v4583_v34, %v3793_v33  ;;  %v4193_v42 = vld [vmem:[#allocation8 + $0x788] sm:$0xf]  ;;  %v3331_v33 = vld [vmem:[#allocation8 + $0xd8] sm:$0xf0]  ;;  %v4497_v34 = vld [vmem:[#allocation8 + $0x1cc] sm:$0xf] }
 0x123   :  { %v4194_v54 = vor.u32 %v4683_v43, %v4193_v42  ;;  %v4667_v40 = vld [vmem:[#allocation8 + $0x714] sm:$0xf0]  ;;  %v3603_v42 = vld [vmem:[#allocation8 + $0x2f8] sm:$0xf0]  ;;  %v3334_v43 = vor.u32 %v4465_v30, %v3331_v33 }
 0x124   :  { %2444 = vmatpush.bf16.msra.mxu3 %v3634_v56  ;;  %2407 = vmatmul.bf16.vlgmr.msra.gmra.mxu0 %v4993_v18  ;;  %v4647_v56 = vld [vmem:[#allocation8 + $0x674] sm:$0xf0] }
 0x125   :  { %2451 = vmatpush.bf16.msrb.mxu0 %v3858_v47  ;;  %2431 = vmatpush.bf16.msra.mxu2 %v3506_v52  ;;  %v3777_v47 = vld [vmem:[#allocation8 + $0x448] sm:$0xf] }
 0x126   :  { %2464 = vmatpush.bf16.msrb.mxu1 %v3986_v49  ;;  %v4579_v49 = vld [vmem:[#allocation8 + $0x454] sm:$0xf0]  ;;  %v3905_v52 = vld [vmem:[#allocation8 + $0x548] sm:$0xf] }
 0x127   :  { %2420 = vmatmul.bf16.vlgmr.msra.gmra.mxu1 %v4996_v23  ;;  %v3778_v57 = vor.u32 %v4579_v49, %v3777_v47  ;;  %v3906_v60 = vor.u32 %v4611_v53, %v3905_v52  ;;  %v3731_v47 = vld [vmem:[#allocation8 + $0x3f8] sm:$0xf0]  ;;  %v4461_v52 = vld [vmem:[#allocation8 + $0xac] sm:$0xf] }
 0x128   :  { %2445 = vmatpush.bf16.msra.mxu3 %v3618_v8  ;;  %v4161_v8 = vld [vmem:[#allocation8 + $0x748] sm:$0xf]  ;;  %v3315_v53 = vld [vmem:[#allocation8 + $0xb8] sm:$0xf0] }
 0x129   :  { %2452 = vmatpush.bf16.msrb.mxu0 %v3842_v63  ;;  %2432 = vmatpush.bf16.msra.mxu2 %v3490_v4  ;;  %v4050_v63 = vor.u32 %v4647_v56, %v4049_v55  ;;  %v4033_v4 = vld [vmem:[#allocation8 + $0x648] sm:$0xf]  ;;  %v4493_v56 = vld [vmem:[#allocation8 + $0x1ac] sm:$0xf]  ;;  %v3318_v61 = vor.u32 %v4461_v52, %v3315_v53  ;;  %v3379_v53 = vld [vmem:[#allocation8 + $0x138] sm:$0xf0] }
 0x12a   :  { %2465 = vmatpush.bf16.msrb.mxu1 %v3970_v0  ;;  %v3889_v0 = vld [vmem:[#allocation8 + $0x528] sm:$0xf]  ;;  %v4477_v52 = vld [vmem:[#allocation8 + $0x12c] sm:$0xf] }
 0x12b   :  { %2446 = vmatmul.bf16.vlgmr.msra.gmra.mxu3 %v5002_v51  ;;  %v3890_v12 = vor.u32 %v4607_v1, %v3889_v0  ;;  %v4457_v1 = vld [vmem:[#allocation8 + $0x8c] sm:$0xf] }
 0x12c   :  { %2490 = vmatpush.bf16.msrb.mxu3 %v4242_v13  ;;  %2433 = vmatmul.bf16.vlgmr.msra.gmra.mxu2 %v5000_v44  ;;  %v4571_v13 = vld [vmem:[#allocation8 + $0x414] sm:$0xf0] }
 0x12d   :  { %2477 = vmatpush.bf16.msrb.mxu2 %v4114_v9  ;;  %2453 = vmatpush.bf16.msrb.mxu0 %v3826_v16  ;;  %v4675_v9 = vld [vmem:[#allocation8 + $0x754] sm:$0xf0]  ;;  %v4034_v16 = vor.u32 %v4643_v5, %v4033_v4  ;;  %v3746_v25 = vor.u32 %v4571_v13, %v3745_v11  ;;  %v3571_v13 = vld [vmem:[#allocation8 + $0x2b8] sm:$0xf0] }
 0x12e   :  { %2466 = vmatpush.bf16.msrb.mxu1 %v3954_v20  ;;  %v4501_v20 = vld [vmem:[#allocation8 + $0x1ec] sm:$0xf]  ;;  %v4162_v21 = vor.u32 %v4675_v9, %v4161_v8  ;;  %v3427_v8 = vld [vmem:[#allocation8 + $0x198] sm:$0xf0] }
 0x12f   :  { %v3478_v31 = vor.u32 %v4501_v20, %v3475_v22  ;;  %v3283_v20 = vld [vmem:[#allocation8 + $0x78] sm:$0xf0]  ;;  %v4485_v22 = vld [vmem:[#allocation8 + $0x16c] sm:$0xf] }
 0x130   :  { %2491 = vmatpush.bf16.msrb.mxu3 %v4226_v26  ;;  %v4145_v26 = vld [vmem:[#allocation8 + $0x728] sm:$0xf] }
 0x131   :  { %2478 = vmatpush.bf16.msrb.mxu2 %v4098_v24  ;;  %2454 = vmatpush.bf16.msrb.mxu0 %v3810_v29  ;;  %v4017_v24 = vld [vmem:[#allocation8 + $0x628] sm:$0xf]  ;;  %v3350_v29 = vor.u32 %v4469_v17, %v3347_v19  ;;  %v4146_v36 = vor.u32 %v4671_v27, %v4145_v26  ;;  %v4453_v19 = vld [vmem:[#allocation8 + $0x6c] sm:$0xf]  ;;  %v3555_v26 = vld [vmem:[#allocation8 + $0x298] sm:$0xf0] }
 0x132   :  { %2467 = vmatpush.bf16.msrb.mxu1 %v3938_v32  ;;  %v4018_v32 = vor.u32 %v4639_v3, %v4017_v24  ;;  %v3411_v24 = vld [vmem:[#allocation8 + $0x178] sm:$0xf0]  ;;  %v3286_v27 = vor.u32 %v4453_v19, %v3283_v20 }
 0x133   :  { %v3414_v30 = vor.u32 %v4485_v22, %v3411_v24  ;;  %v3635_v19 = vld [vmem:[#allocation8 + $0x338] sm:$0xf0]  ;;  %v4593_v22 = vld [vmem:[#allocation8 + $0x4cc] sm:$0xf] }
 0x134   :  { %2492 = vmatpush.bf16.msrb.mxu3 %v4210_v38  ;;  %v4635_v38 = vld [vmem:[#allocation8 + $0x614] sm:$0xf0] }
 0x135   :  { %2479 = vmatpush.bf16.msrb.mxu2 %v4082_v35  ;;  %2455 = vmatpush.bf16.msrb.mxu0 %v3794_v41  ;;  %v3459_v35 = vld [vmem:[#allocation8 + $0x1d8] sm:$0xf0]  ;;  %v4533_v41 = vld [vmem:[#allocation8 + $0x2ec] sm:$0xf] }
 0x136   :  { %2468 = vmatpush.bf16.msrb.mxu1 %v3922_v46  ;;  %v4565_v46 = vld [vmem:[#allocation8 + $0x3ec] sm:$0xf]  ;;  %v3462_v49 = vor.u32 %v4497_v34, %v3459_v35  ;;  %v3606_v55 = vor.u32 %v4533_v41, %v3603_v42 }
 0x137   :  { %v3734_v58 = vor.u32 %v4565_v46, %v3731_v47  ;;  %v4481_v35 = vld [vmem:[#allocation8 + $0x14c] sm:$0xf] }
 0x138   :  { %2493 = vmatpush.bf16.msrb.mxu3 %v4194_v54  ;;  %v4130_v54 = vor.u32 %v4667_v40, %v4129_v39  ;;  %v4517_v39 = vld [vmem:[#allocation8 + $0x26c] sm:$0xf]  ;;  %v3539_v40 = vld [vmem:[#allocation8 + $0x278] sm:$0xf0] }
 0x139   :  { %2480 = vmatpush.bf16.msrb.mxu2 %v4066_v50  ;;  %2456 = vmatpush.bf16.msrb.mxu0 %v3778_v57  ;;  %v4002_v50 = vor.u32 %v4635_v38, %v4001_v37  ;;  %v3443_v57 = vld [vmem:[#allocation8 + $0x1b8] sm:$0xf0]  ;;  %v4549_v42 = vld [vmem:[#allocation8 + $0x36c] sm:$0xf] }
 0x13a   :  { %2469 = vmatpush.bf16.msrb.mxu1 %v3906_v60  ;;  %v3587_v60 = vld [vmem:[#allocation8 + $0x2d8] sm:$0xf0]  ;;  %v3446_v0 = vor.u32 %v4493_v56, %v3443_v57  ;;  %v4445_v47 = vld [vmem:[#allocation8 + $0x2c] sm:$0xf] }
 0x13b   :  { %v3590_v5 = vor.u32 %v4529_v59, %v3587_v60  ;;  %v4513_v56 = vld [vmem:[#allocation8 + $0x24c] sm:$0xf]  ;;  %v3523_v57 = vld [vmem:[#allocation8 + $0x258] sm:$0xf0] }
 0x13c   :  { %2494 = vmatpush.bf16.msrb.mxu3 %v4178_v2  ;;  %v3299_v2 = vld [vmem:[#allocation8 + $0x98] sm:$0xf0]  ;;  %v4545_v60 = vld [vmem:[#allocation8 + $0x34c] sm:$0xf] }
 0x13d   :  { %2481 = vmatpush.bf16.msrb.mxu2 %v4050_v63  ;;  %2457 = vmatpush.bf16.msrb.mxu0 %v3762_v6  ;;  %v3715_v63 = vld [vmem:[#allocation8 + $0x3d8] sm:$0xf0]  ;;  %v4489_v6 = vld [vmem:[#allocation8 + $0x18c] sm:$0xf]  ;;  %v3302_v14 = vor.u32 %v4457_v1, %v3299_v2 }
 0x13e   :  { %2470 = vmatpush.bf16.msrb.mxu1 %v3890_v12  ;;  %v3718_v9 = vor.u32 %v4561_v62, %v3715_v63  ;;  %v4525_v12 = vld [vmem:[#allocation8 + $0x2ac] sm:$0xf]  ;;  %v3430_v17 = vor.u32 %v4489_v6, %v3427_v8  ;;  %v3382_v63 = vor.u32 %v4477_v52, %v3379_v53  ;;  %v3363_v2 = vld [vmem:[#allocation8 + $0x118] sm:$0xf0] }
 0x13f   :  { %v4441_v62 = vld [vmem:[#allocation8 + $0xc] sm:$0xf]  ;;  %v3859_v8 = vld [vmem:[#allocation8 + $0x4f8] sm:$0xf0] }
 0x140   :  { %2495 = vmatpush.bf16.msrb.mxu3 %v4162_v21  ;;  %v5036_v4 = vpop.f32.mrf.mxu0  ;;  %v5038_v11 = vpop.f32.mrf.mxu1  ;;  %v3574_v21 = vor.u32 %v4525_v12, %v3571_v13  ;;  %v4473_v1 = vld [vmem:[#allocation8 + $0x10c] sm:$0xf]  ;;  %v3987_v13 = vld [vmem:[#allocation8 + $0x5f8] sm:$0xf0] }
 0x141   :  { %2482 = vmatpush.bf16.msrb.mxu2 %v4034_v16  ;;  %2458 = vmatpush.bf16.msrb.mxu0 %v3746_v25  ;;  %v3699_v16 = vld [vmem:[#allocation8 + $0x3b8] sm:$0xf0]  ;;  %v4521_v25 = vld [vmem:[#allocation8 + $0x28c] sm:$0xf]  ;;  %v3366_v20 = vor.u32 %v4473_v1, %v3363_v2 }
 0x142   :  { %2471 = vmatpush.bf16.msrb.mxu1 %v3874_v28  ;;  %v3702_v3 = vor.u32 %v4557_v15, %v3699_v16  ;;  %v4553_v28 = vld [vmem:[#allocation8 + $0x38c] sm:$0xf]  ;;  %v3558_v34 = vor.u32 %v4521_v25, %v3555_v26  ;;  %v3507_v15 = vld [vmem:[#allocation8 + $0x238] sm:$0xf0] }
 0x143   :  { %v4597_v6 = vld [vmem:[#allocation8 + $0x4ec] sm:$0xf]  ;;  %v3843_v25 = vld [vmem:[#allocation8 + $0x4d8] sm:$0xf0] }
 0x144   :  { %2496 = vmatpush.bf16.msrb.mxu3 %v4146_v36  ;;  %2459 = vmatmul.bf16.vlgmr.msrb.gmra.mxu0 %v5009_v7  ;;  %v3395_v36 = vld [vmem:[#allocation8 + $0x158] sm:$0xf0]  ;;  %v4625_v26 = vld [vmem:[#allocation8 + $0x5cc] sm:$0xf] }
 0x145   :  { %2503 = vmatpush.bf16.msra.mxu0 %v3350_v29  ;;  %2483 = vmatpush.bf16.msrb.mxu2 %v4018_v32  ;;  %v3683_v29 = vld [vmem:[#allocation8 + $0x398] sm:$0xf0]  ;;  %v3398_v46 = vor.u32 %v4481_v35, %v3395_v36  ;;  %v4661_v35 = vld [vmem:[#allocation8 + $0x6ec] sm:$0xf] }
 0x146   :  { %2516 = vmatpush.bf16.msra.mxu1 %v3478_v31  ;;  %v4449_v31 = vld [vmem:[#allocation8 + $0x4c] sm:$0xf]  ;;  %v3267_v32 = vld [vmem:[#allocation8 + $0x58] sm:$0xf0]  ;;  %v3686_v37 = vor.u32 %v4553_v28, %v3683_v29 }
 0x147   :  { %2472 = vmatmul.bf16.vlgmr.msrb.gmra.mxu1 %v5012_v10  ;;  %v3270_v41 = vor.u32 %v4449_v31, %v3267_v32  ;;  %v3491_v31 = vld [vmem:[#allocation8 + $0x218] sm:$0xf0]  ;;  %v4537_v32 = vld [vmem:[#allocation8 + $0x30c] sm:$0xf] }
 0x148   :  { %2497 = vmatpush.bf16.msrb.mxu3 %v4130_v54  ;;  %v2202_v33 = vpop.f32.mrf.mxu0  ;;  %v2215_v38 = vpop.f32.mrf.mxu1  ;;  %v4115_v36 = vld [vmem:[#allocation8 + $0x6f8] sm:$0xf0]  ;;  %v4657_v53 = vld [vmem:[#allocation8 + $0x6cc] sm:$0xf] }
 0x149   :  { %2504 = vmatpush.bf16.msra.mxu0 %v3334_v43  ;;  %2484 = vmatpush.bf16.msrb.mxu2 %v4002_v50  ;;  %v3667_v43 = vld [vmem:[#allocation8 + $0x378] sm:$0xf0]  ;;  %v3542_v50 = vor.u32 %v4517_v39, %v3539_v40  ;;  %v4693_v38 = vld [vmem:[#allocation8 + $0x7ec] sm:$0xf] }
 0x14a   :  { %2517 = vmatpush.bf16.msra.mxu1 %v3462_v49  ;;  %v3251_v49 = vld [vmem:[#allocation8 + $0x38] sm:$0xf0]  ;;  %v4653_v2 = vld [vmem:[#allocation8 + $0x6ac] sm:$0xf] }
 0x14b   :  { %2498 = vmatmul.bf16.vlgmr.msrb.gmra.mxu3 %v5018_v45  ;;  %v3254_v59 = vor.u32 %v4445_v47, %v3251_v49  ;;  %v4243_v39 = vld [vmem:[#allocation8 + $0x7f8] sm:$0xf0]  ;;  %v4118_v47 = vor.u32 %v4661_v35, %v4115_v36  ;;  %v4621_v49 = vld [vmem:[#allocation8 + $0x5ac] sm:$0xf] }
 0x14c   :  { %2542 = vmatpush.bf16.msra.mxu3 %v3734_v58  ;;  %2485 = vmatmul.bf16.vlgmr.msrb.gmra.mxu2 %v5016_v48  ;;  %v4246_v52 = vor.u32 %v4693_v38, %v4243_v39  ;;  %v4677_v36 = vld [vmem:[#allocation8 + $0x76c] sm:$0xf] }
 0x14d   :  { %2529 = vmatpush.bf16.msra.mxu2 %v3606_v55  ;;  %2505 = vmatpush.bf16.msra.mxu0 %v3318_v61  ;;  %v3670_v55 = vor.u32 %v4549_v42, %v3667_v43  ;;  %v3651_v61 = vld [vmem:[#allocation8 + $0x358] sm:$0xf0]  ;;  %v4589_v42 = vld [vmem:[#allocation8 + $0x4ac] sm:$0xf] }
 0x14e   :  { %2518 = vmatpush.bf16.msra.mxu1 %v3446_v0  ;;  %v5044_v58 = vpop.f32.mrf.mxu3  ;;  %v3235_v0 = vld [vmem:[#allocation8 + $0x18] sm:$0xf0]  ;;  %v3654_v12 = vor.u32 %v4545_v60, %v3651_v61  ;;  %v4585_v61 = vld [vmem:[#allocation8 + $0x48c] sm:$0xf] }
 0x14f   :  { %v5042_v54 = vpop.f32.mrf.mxu2  ;;  %v3238_v16 = vor.u32 %v4441_v62, %v3235_v0  ;;  %v3827_v43 = vld [vmem:[#allocation8 + $0x4b8] sm:$0xf0]  ;;  %v4573_v39 = vld [vmem:[#allocation8 + $0x42c] sm:$0xf] }
 0x150   :  { %2543 = vmatpush.bf16.msra.mxu3 %v3718_v9  ;;  %v4629_v9 = vld [vmem:[#allocation8 + $0x5ec] sm:$0xf]  ;;  %v3811_v62 = vld [vmem:[#allocation8 + $0x498] sm:$0xf0] }
 0x151   :  { %2530 = vmatpush.bf16.msra.mxu2 %v3590_v5  ;;  %2506 = vmatpush.bf16.msra.mxu0 %v3302_v14  ;;  %v3526_v5 = vor.u32 %v4513_v56, %v3523_v57  ;;  %v4509_v14 = vld [vmem:[#allocation8 + $0x22c] sm:$0xf]  ;;  %v3990_v24 = vor.u32 %v4629_v9, %v3987_v13  ;;  %v3830_v56 = vor.u32 %v4589_v42, %v3827_v43  ;;  %v3939_v0 = vld [vmem:[#allocation8 + $0x598] sm:$0xf0] }
 0x152   :  { %2519 = vmatpush.bf16.msra.mxu1 %v3430_v17  ;;  %v4541_v17 = vld [vmem:[#allocation8 + $0x32c] sm:$0xf]  ;;  %v3891_v43 = vld [vmem:[#allocation8 + $0x538] sm:$0xf0] }
 0x153   :  { %v3638_v29 = vor.u32 %v4541_v17, %v3635_v19  ;;  %v4689_v57 = vld [vmem:[#allocation8 + $0x7cc] sm:$0xf]  ;;  %v3923_v19 = vld [vmem:[#allocation8 + $0x578] sm:$0xf0] }
 0x154   :  { %2544 = vmatpush.bf16.msra.mxu3 %v3702_v3  ;;  %v3510_v3 = vor.u32 %v4509_v14, %v3507_v15  ;;  %v4685_v9 = vld [vmem:[#allocation8 + $0x7ac] sm:$0xf]  ;;  %v3795_v15 = vld [vmem:[#allocation8 + $0x478] sm:$0xf0] }
 0x155   :  { %2531 = vmatpush.bf16.msra.mxu2 %v3574_v21  ;;  %2507 = vmatpush.bf16.msra.mxu0 %v3286_v27  ;;  %v3862_v21 = vor.u32 %v4597_v6, %v3859_v8  ;;  %v3971_v27 = vld [vmem:[#allocation8 + $0x5d8] sm:$0xf0]  ;;  %v3814_v8 = vor.u32 %v4585_v61, %v3811_v62  ;;  %v4581_v14 = vld [vmem:[#allocation8 + $0x46c] sm:$0xf] }
 0x156   :  { %2520 = vmatpush.bf16.msra.mxu1 %v3414_v30  ;;  %v4505_v30 = vld [vmem:[#allocation8 + $0x20c] sm:$0xf]  ;;  %v2241_v33 = vpop.f32.mrf.mxu3  ;;  %v3974_v40 = vor.u32 %v4625_v26, %v3971_v27  ;;  %v3747_v61 = vld [vmem:[#allocation8 + $0x418] sm:$0xf0] }
 0x157   :  { %v2228_v28 = vpop.f32.mrf.mxu2  ;;  %v4613_v17 = vld [vmem:[#allocation8 + $0x56c] sm:$0xf]  ;;  %v4051_v33 = vld [vmem:[#allocation8 + $0x678] sm:$0xf0] }
 0x158   :  { %2545 = vmatpush.bf16.msra.mxu3 %v3686_v37  ;;  %v3846_v37 = vor.u32 %v4593_v22, %v3843_v25  ;;  %v3798_v22 = vor.u32 %v4581_v14, %v3795_v15  ;;  %v3926_v25 = vor.u32 %v4613_v17, %v3923_v19  ;;  %v4577_v26 = vld [vmem:[#allocation8 + $0x44c] sm:$0xf]  ;;  %v4147_v14 = vld [vmem:[#allocation8 + $0x738] sm:$0xf0] }
 0x159   :  { %2532 = vmatpush.bf16.msra.mxu2 %v3558_v34  ;;  %2508 = vmatpush.bf16.msra.mxu0 %v3270_v41  ;;  %v3619_v34 = vld [vmem:[#allocation8 + $0x318] sm:$0xf0]  ;;  %v3494_v41 = vor.u32 %v4505_v30, %v3491_v31  ;;  %v4609_v28 = vld [vmem:[#allocation8 + $0x54c] sm:$0xf] }
 0x15a   :  { %2521 = vmatpush.bf16.msra.mxu1 %v3398_v46  ;;  %v3622_v46 = vor.u32 %v4537_v32, %v3619_v34  ;;  %v4645_v32 = vld [vmem:[#allocation8 + $0x66c] sm:$0xf] }
 0x15b   :  { %v4605_v42 = vld [vmem:[#allocation8 + $0x52c] sm:$0xf] }
 0x15c   :  { %2546 = vmatpush.bf16.msra.mxu3 %v3670_v55  ;;  %v4099_v55 = vld [vmem:[#allocation8 + $0x6d8] sm:$0xf0] }
 0x15d   :  { %2533 = vmatpush.bf16.msra.mxu2 %v3542_v50  ;;  %2509 = vmatpush.bf16.msra.mxu0 %v3254_v59  ;;  %v3955_v50 = vld [vmem:[#allocation8 + $0x5b8] sm:$0xf0] }
 0x15e   :  { %2522 = vmatpush.bf16.msra.mxu1 %v3382_v63  ;;  %v4227_v59 = vld [vmem:[#allocation8 + $0x7d8] sm:$0xf0]  ;;  %v3958_v60 = vor.u32 %v4621_v49, %v3955_v50  ;;  %v4617_v63 = vld [vmem:[#allocation8 + $0x58c] sm:$0xf] }
 0x15f   :  { %v3942_v13 = vor.u32 %v4617_v63, %v3939_v0  ;;  %v4641_v49 = vld [vmem:[#allocation8 + $0x64c] sm:$0xf]  ;;  %v4035_v50 = vld [vmem:[#allocation8 + $0x658] sm:$0xf0] }
 0x160   :  { %2547 = vmatpush.bf16.msra.mxu3 %v3654_v12  ;;  %v5048_v1 = vpop.f32.mrf.mxu0  ;;  %v5051_v6 = vpop.f32.mrf.mxu1  ;;  %v4211_v12 = vld [vmem:[#allocation8 + $0x7b8] sm:$0xf0]  ;;  %v4601_v63 = vld [vmem:[#allocation8 + $0x50c] sm:$0xf] }
 0x161   :  { %2534 = vmatpush.bf16.msra.mxu2 %v3526_v5  ;;  %2510 = vmatpush.bf16.msra.mxu0 %v3238_v16  ;;  %v4083_v5 = vld [vmem:[#allocation8 + $0x6b8] sm:$0xf0] }
 0x162   :  { %2523 = vmatpush.bf16.msra.mxu1 %v3366_v20  ;;  %v4086_v16 = vor.u32 %v4653_v2, %v4083_v5  ;;  %v4214_v20 = vor.u32 %v4685_v9, %v4211_v12  ;;  %v3875_v0 = vld [vmem:[#allocation8 + $0x518] sm:$0xf0]  ;;  %v4637_v5 = vld [vmem:[#allocation8 + $0x62c] sm:$0xf] }
 0x163   :  { %v3878_v15 = vor.u32 %v4601_v63, %v3875_v0 }
 0x164   :  { %2548 = vmatpush.bf16.msra.mxu3 %v3638_v29  ;;  %2511 = vmatmul.bf16.vlgmr.msra.gmra.mxu0 %v4993_v18  ;;  %v4102_v18 = vor.u32 %v4657_v53, %v4099_v55  ;;  %v3907_v29 = vld [vmem:[#allocation8 + $0x558] sm:$0xf0]  ;;  %v4673_v55 = vld [vmem:[#allocation8 + $0x74c] sm:$0xf] }
 0x165   :  { %2555 = vmatpush.bf16.msrb.mxu0 %v3862_v21  ;;  %2535 = vmatpush.bf16.msra.mxu2 %v3510_v3  ;;  %v4649_v21 = vld [vmem:[#allocation8 + $0x68c] sm:$0xf]  ;;  %v4195_v3 = vld [vmem:[#allocation8 + $0x798] sm:$0xf0]  ;;  %v3910_v38 = vor.u32 %v4609_v28, %v3907_v29  ;;  %v4710_v29 = vld [vmem:[#allocation11 + $0x70] sm:$0xff] }
 0x166   :  { %2568 = vmatpush.bf16.msrb.mxu1 %v3990_v24  ;;  %v4681_v24 = vld [vmem:[#allocation8 + $0x78c] sm:$0xf] }
 0x167   :  { %2524 = vmatmul.bf16.vlgmr.msra.gmra.mxu1 %v4996_v23  ;;  %v4230_v23 = vor.u32 %v4689_v57, %v4227_v59  ;;  %v4198_v31 = vor.u32 %v4681_v24, %v4195_v3  ;;  %v3894_v59 = vor.u32 %v4605_v42, %v3891_v43  ;;  %v4665_v3 = vld [vmem:[#allocation8 + $0x70c] sm:$0xf]  ;;  %v4699_v43 = vld [vmem:[#allocation11 + $0x18] sm:$0xff] }
 0x168   :  { %2549 = vmatpush.bf16.msra.mxu3 %v3622_v46  ;;  %v2254_v30 = vpop.f32.mrf.mxu0  ;;  %v2267_v34 = vpop.f32.mrf.mxu1  ;;  %v5054_v46 = vld [vmem:[#allocation10] sm:$0xf] }
 0x169   :  { %2556 = vmatpush.bf16.msrb.mxu0 %v3846_v37  ;;  %2536 = vmatpush.bf16.msra.mxu2 %v3494_v41  ;;  %v4179_v37 = vld [vmem:[#allocation8 + $0x778] sm:$0xf0]  ;;  %v4054_v41 = vor.u32 %v4645_v32, %v4051_v33  ;;  %v903_v62 = vperm.slane %v5054_v46, 0  ;;  %v904_v28 = vperm.slane %v5054_v46, 1  ;;  %v4701_v33 = vld [vmem:[#allocation11 + $0x28] sm:$0xff] }
 0x16a   :  { %2569 = vmatpush.bf16.msrb.mxu1 %v3974_v40  ;;  %v3763_v40 = vld [vmem:[#allocation8 + $0x438] sm:$0xf0] }
 0x16b   :  { %2550 = vmatmul.bf16.vlgmr.msra.gmra.mxu3 %v5002_v51  ;;  %v3779_v51 = vld [vmem:[#allocation8 + $0x458] sm:$0xf0]  ;;  %v3766_v53 = vor.u32 %v4573_v39, %v3763_v40  ;;  %v2201_v17 = vadd.f32 %v5036_v4, %v903_v62  ;;  %v4705_v62 = vld [vmem:[#allocation11 + $0x48] sm:$0xff] }
 0x16c   :  { %2594 = vmatpush.bf16.msrb.mxu3 %v4246_v52  ;;  %2537 = vmatmul.bf16.vlgmr.msra.gmra.mxu2 %v5000_v44  ;;  %v4067_v44 = vld [vmem:[#allocation8 + $0x698] sm:$0xf0]  ;;  %v3782_v35 = vor.u32 %v4577_v26, %v3779_v51  ;;  %v4702_v51 = vld [vmem:[#allocation11 + $0x30] sm:$0xff] }
 0x16d   :  { %2581 = vmatpush.bf16.msrb.mxu2 %v4118_v47  ;;  %2557 = vmatpush.bf16.msrb.mxu0 %v3830_v56  ;;  %v4070_v27 = vor.u32 %v4649_v21, %v4067_v44  ;;  %v4182_v47 = vor.u32 %v4677_v36, %v4179_v37  ;;  %v4163_v56 = vld [vmem:[#allocation8 + $0x758] sm:$0xf0]  ;;  %v4633_v44 = vld [vmem:[#allocation8 + $0x60c] sm:$0xf] }
 0x16e   :  { %2570 = vmatpush.bf16.msrb.mxu1 %v3958_v60  ;;  %v5056_v52 = vpop.f32.mrf.mxu2  ;;  %v5058_v57 = vpop.f32.mrf.mxu3  ;;  %v4569_v60 = vld [vmem:[#allocation8 + $0x40c] sm:$0xf]  ;;  %v4166_v2 = vor.u32 %v4673_v55, %v4163_v56  ;;  %v4706_v55 = vld [vmem:[#allocation11 + $0x50] sm:$0xff] }
 0x16f   :  { %v3750_v12 = vor.u32 %v4569_v60, %v3747_v61  ;;  %v4697_v60 = vld [vmem:[#allocation11 + $0x8] sm:$0xff] }
 0x170   :  { %2595 = vmatpush.bf16.msrb.mxu3 %v4230_v23  ;;  %v2304_v23 = vpop.f32.mrf.mxu0  ;;  %v2317_v9 = vpop.f32.mrf.mxu1 }
 0x171   :  { %2582 = vmatpush.bf16.msrb.mxu2 %v4102_v18  ;;  %2558 = vmatpush.bf16.msrb.mxu0 %v3814_v8  ;;  %v4038_v18 = vor.u32 %v4641_v49, %v4035_v50  ;;  %v4019_v8 = vld [vmem:[#allocation8 + $0x638] sm:$0xf0] }
 0x172   :  { %2571 = vmatpush.bf16.msrb.mxu1 %v3942_v13  ;;  %v4669_v13 = vld [vmem:[#allocation8 + $0x72c] sm:$0xf]  ;;  %v4022_v19 = vor.u32 %v4637_v5, %v4019_v8 }
 0x173   :  { %v4150_v21 = vor.u32 %v4669_v13, %v4147_v14  ;;  %v4718_v13 = vld [vmem:[#allocation11 + $0xb0] sm:$0xff]  ;;  %v4717_v14 = vld [vmem:[#allocation11 + $0xa8] sm:$0xff] }
 0x174   :  { %2596 = vmatpush.bf16.msrb.mxu3 %v4214_v20  ;;  %v4711_v20 = vld [vmem:[#allocation11 + $0x78] sm:$0xff] }
 0x175   :  { %2583 = vmatpush.bf16.msrb.mxu2 %v4086_v16  ;;  %2559 = vmatpush.bf16.msrb.mxu0 %v3798_v22  ;;  %v4703_v16 = vld [vmem:[#allocation11 + $0x38] sm:$0xff] }
 0x176   :  { %2572 = vmatpush.bf16.msrb.mxu1 %v3926_v25  ;;  %v4003_v22 = vld [vmem:[#allocation8 + $0x618] sm:$0xf0]  ;;  %v2280_v24 = vpop.f32.mrf.mxu2  ;;  %v2293_v26 = vpop.f32.mrf.mxu3 }
 0x177   :  { %v4131_v25 = vld [vmem:[#allocation8 + $0x718] sm:$0xf0]  ;;  %v4006_v4 = vor.u32 %v4633_v44, %v4003_v22  ;;  %v4714_v44 = vld [vmem:[#allocation11 + $0x90] sm:$0xff] }
 0x178   :  { %2597 = vmatpush.bf16.msrb.mxu3 %v4198_v31  ;;  %v2306_v30 = vpop.f32.mrf.mxu0  ;;  %v4134_v31 = vor.u32 %v4665_v3, %v4131_v25  ;;  %v2319_v32 = vpop.f32.mrf.mxu1  ;;  %v4713_v3 = vld [vmem:[#allocation11 + $0x88] sm:$0xff] }
 0x179   :  { %2584 = vmatpush.bf16.msrb.mxu2 %v4070_v27  ;;  %2560 = vmatpush.bf16.msrb.mxu0 %v3782_v35  ;;  %v2214_v27 = vadd.f32 %v5038_v11, %v2201_v17  ;;  %v2305_v35 = vadd.f32 %v2304_v23, %v904_v28  ;;  %v4709_v11 = vld [vmem:[#allocation11 + $0x68] sm:$0xff]  ;;  %v4696_v23 = vld [vmem:[#allocation11] sm:$0xff] }
 0x17a   :  { %2573 = vmatpush.bf16.msrb.mxu1 %v3910_v38  ;;  %v4716_v17 = vld [vmem:[#allocation11 + $0xa0] sm:$0xff] }
 0x17b   :  { %v2227_v34 = vadd.f32 %v5042_v54, %v2214_v27  ;;  %v2318_v39 = vadd.f32 %v2317_v9, %v2305_v35  ;;  %v905_v27 = vperm.slane %v5054_v46, 2 }
 0x17c   :  { %2598 = vmatpush.bf16.msrb.mxu3 %v4182_v47  ;;  %v4707_v47 = vld [vmem:[#allocation11 + $0x58] sm:$0xff] }
 0x17d   :  { %2585 = vmatpush.bf16.msrb.mxu2 %v4054_v41  ;;  %2561 = vmatpush.bf16.msrb.mxu0 %v3766_v53  ;;  %v2240_v38 = vadd.f32 %v5044_v58, %v2227_v34  ;;  %v4698_v58 = vld [vmem:[#allocation11 + $0x10] sm:$0xff] }
 0x17e   :  { %2574 = vmatpush.bf16.msrb.mxu1 %v3894_v59  ;;  %v2330_v36 = vpop.f32.mrf.mxu2  ;;  %v2343_v37 = vpop.f32.mrf.mxu3 }
 0x17f   :  { %v2253_v54 = vadd.f32 %v5048_v1, %v2240_v38  ;;  %v2331_v40 = vadd.f32 %v2330_v36, %v2318_v39  ;;  %v4727_v38 = vld [vmem:[#allocation11 + $0xf8] sm:$0xff] }
 0x180   :  { %2599 = vmatpush.bf16.msrb.mxu3 %v4166_v2 }
 0x181   :  { %2586 = vmatpush.bf16.msrb.mxu2 %v4038_v18  ;;  %2562 = vmatpush.bf16.msrb.mxu0 %v3750_v12  ;;  %v2356_v41 = vpop.f32.mrf.mxu0  ;;  %v2344_v49 = vadd.f32 %v2343_v37, %v2331_v40 }
 0x182   :  { %2575 = vmatpush.bf16.msrb.mxu1 %v3878_v15 }
 0x183   :  { %v2357_v56 = vadd.f32 %v2356_v41, %v2344_v49  ;;  %v4726_v41 = vld [vmem:[#allocation11 + $0xf0] sm:$0xff]  ;;  %v4724_v49 = vld [vmem:[#allocation11 + $0xe0] sm:$0xff] }
 0x184   :  { %2600 = vmatpush.bf16.msrb.mxu3 %v4150_v21  ;;  %2563 = vmatmul.bf16.vlgmr.msrb.gmra.mxu0 %v5009_v7  ;;  %v4700_v7 = vld [vmem:[#allocation11 + $0x20] sm:$0xff]  ;;  %v2369_v42 = vpop.f32.mrf.mxu1 }
 0x185   :  { %2875 = vmatpush.bf16.msra.mxu0 %v4703_v16  ;;  %2587 = vmatpush.bf16.msrb.mxu2 %v4022_v19  ;;  %v2370_v18 = vadd.f32 %v2369_v42, %v2357_v56 }
 0x186   :  { %2888 = vmatpush.bf16.msra.mxu1 %v4711_v20  ;;  %v2332_v50 = vpop.f32.mrf.mxu2  ;;  %v2345_v53 = vpop.f32.mrf.mxu3  ;;  %v4715_v20 = vld [vmem:[#allocation11 + $0x98] sm:$0xff] }
 0x187   :  { %2576 = vmatmul.bf16.vlgmr.msrb.gmra.mxu1 %v5012_v10  ;;  %v4708_v10 = vld [vmem:[#allocation11 + $0x60] sm:$0xff]  ;;  %v4723_v53 = vld [vmem:[#allocation11 + $0xd8] sm:$0xff] }
 0x188   :  { %2601 = vmatpush.bf16.msrb.mxu3 %v4134_v31 }
 0x189   :  { %2876 = vmatpush.bf16.msra.mxu0 %v4702_v51  ;;  %2588 = vmatpush.bf16.msrb.mxu2 %v4006_v4  ;;  %v2358_v1 = vpop.f32.mrf.mxu0  ;;  %v4712_v51 = vld [vmem:[#allocation11 + $0x80] sm:$0xff] }
 0x18a   :  { %2889 = vmatpush.bf16.msra.mxu1 %v4710_v29  ;;  %v4721_v1 = vld [vmem:[#allocation11 + $0xc8] sm:$0xff] }
 0x18b   :  { %2602 = vmatmul.bf16.vlgmr.msrb.gmra.mxu3 %v5018_v45 }
 0x18c   :  { %2589 = vmatmul.bf16.vlgmr.msrb.gmra.mxu2 %v5016_v48  ;;  %v2266_v48 = vadd.f32 %v5051_v6, %v2253_v54  ;;  %v2371_v59 = vpop.f32.mrf.mxu1  ;;  %v4719_v6 = vld [vmem:[#allocation11 + $0xb8] sm:$0xff]  ;;  %2914 = vmatpush.bf16.msra.mxu3 %v4727_v38 }
 0x18d   :  { %2877 = vmatpush.bf16.msra.mxu0 %v4701_v33  ;;  %2901 = vmatpush.bf16.msra.mxu2 %v4719_v6 }
 0x18e   :  { %2890 = vmatpush.bf16.msra.mxu1 %v4709_v11  ;;  %v2279_v45 = vadd.f32 %v5056_v52, %v2266_v48  ;;  %v2395_v0 = vpop.f32.mrf.mxu3  ;;  %v4704_v52 = vld [vmem:[#allocation11 + $0x40] sm:$0xff] }
 0x18f   :  { %v2382_v63 = vpop.f32.mrf.mxu2 }
 0x190   :  { %v2292_v61 = vadd.f32 %v5058_v57, %v2279_v45  ;;  %v2383_v5 = vadd.f32 %v2382_v63, %v2370_v18  ;;  %2915 = vmatpush.bf16.msra.mxu3 %v4726_v41  ;;  %v4722_v45 = vld [vmem:[#allocation11 + $0xd0] sm:$0xff] }
 0x191   :  { %2878 = vmatpush.bf16.msra.mxu0 %v4700_v7  ;;  %2902 = vmatpush.bf16.msra.mxu2 %v4718_v13 }
 0x192   :  { %2891 = vmatpush.bf16.msra.mxu1 %v4708_v10  ;;  %v2607_v2 = vmax.f32 %v2292_v61, 0.0  ;;  %v2396_v8 = vadd.f32 %v2395_v0, %v2383_v5  ;;  %v4720_v61 = vld [vmem:[#allocation11 + $0xc0] sm:$0xff] }
 0x194   :  { %v2611_v9 = vpack.c.bf16 %v2607_v2, %v2607_v2  ;;  %v2608_v12 = vmax.f32 %v2396_v8, 0.0 }
 0x195   :  { %2879 = vmatpush.bf16.msra.mxu0 %v4699_v43  ;;  %2903 = vmatpush.bf16.msra.mxu2 %v4717_v14 }
 0x196   :  { %2892 = vmatpush.bf16.msra.mxu1 %v4707_v47  ;;  %v2612_v57 = vpack.c.bf16 %v2608_v12, %v2608_v12  ;;  %v2397_v16 = vpop.f32.mrf.mxu3  ;;  %v4725_v47 = vld [vmem:[#allocation11 + $0xe8] sm:$0xff] }
 0x197   :  { %v2384_v15 = vpop.f32.mrf.mxu2  ;;  %2916 = vmatpush.bf16.msra.mxu3 %v4725_v47 }
 0x199   :  { %2880 = vmatpush.bf16.msra.mxu0 %v4698_v58  ;;  %2904 = vmatpush.bf16.msra.mxu2 %v4716_v17 }
 0x19a   :  { %2893 = vmatpush.bf16.msra.mxu1 %v4706_v55 }
 0x19b   :  { %2917 = vmatpush.bf16.msra.mxu3 %v4724_v49 }
 0x19d   :  { %2881 = vmatpush.bf16.msra.mxu0 %v4697_v60  ;;  %2905 = vmatpush.bf16.msra.mxu2 %v4715_v20 }
 0x19e   :  { %2894 = vmatpush.bf16.msra.mxu1 %v4705_v62  ;;  %v906_v62 = vperm.slane %v5054_v46, 3 }
 0x19f   :  { %2918 = vmatpush.bf16.msra.mxu3 %v4723_v53 }
 0x1a1   :  { %2882 = vmatpush.bf16.msra.mxu0 %v4696_v23  ;;  %v2408_v19 = vpop.f32.mrf.mxu0  ;;  %2906 = vmatpush.bf16.msra.mxu2 %v4714_v44 }
 0x1a2   :  { %2895 = vmatpush.bf16.msra.mxu1 %v4704_v52  ;;  %v2409_v29 = vadd.f32 %v2408_v19, %v905_v27 }
 0x1a3   :  { %2919 = vmatpush.bf16.msra.mxu3 %v4722_v45 }
 0x1a4   :  { %2883 = vmatmul.bf16.vlgmr.msra.gmra.mxu0 %v2611_v9  ;;  %v2421_v21 = vpop.f32.mrf.mxu1 }
 0x1a5   :  { %2896 = vmatmul.bf16.vlgmr.msra.gmra.mxu1 %v2612_v57  ;;  %2907 = vmatpush.bf16.msra.mxu2 %v4713_v3  ;;  %v2422_v30 = vadd.f32 %v2421_v21, %v2409_v29  ;;  %v4740_v21 = vld [vmem:[%s5094_s6] ss:$0 sm:$0xff] }
 0x1a7   :  { %2920 = vmatpush.bf16.msra.mxu3 %v4721_v1 }
 0x1a9   :  { %v2410_v22 = vpop.f32.mrf.mxu0  ;;  %2908 = vmatpush.bf16.msra.mxu2 %v4712_v51 }
 0x1ab   :  { %2921 = vmatpush.bf16.msra.mxu3 %v4720_v61 }
 0x1ac   :  { %v2423_v24 = vpop.f32.mrf.mxu1 }
 0x1ae   :  { %v2447_v26 = vpop.f32.mrf.mxu3 }
 0x1af   :  { %v2434_v25 = vpop.f32.mrf.mxu2 }
 0x1b0   :  { %v2435_v32 = vadd.f32 %v2434_v25, %v2422_v30  ;;  %v4741_v30 = vld [vmem:[%s5095_s7] ss:$0 sm:$0xff] }
 0x1b2   :  { %v2448_v34 = vadd.f32 %v2447_v26, %v2435_v32 }
 0x1b6   :  { %v2449_v4 = vpop.f32.mrf.mxu3 }
 0x1b7   :  { %v2436_v28 = vpop.f32.mrf.mxu2 }
 0x1c1   :  { %v2460_v31 = vpop.f32.mrf.mxu0 }
 0x1c2   :  { %v2461_v35 = vadd.f32 %v2460_v31, %v2448_v34  ;;  %v2936_v34 = vstv %s5096_s8 }
 0x1c4   :  { %v2473_v33 = vpop.f32.mrf.mxu1 }
 0x1c5   :  { %v2474_v37 = vadd.f32 %v2473_v33, %v2461_v35 }
 0x1c9   :  { %v2462_v11 = vpop.f32.mrf.mxu0 }
 0x1cc   :  { %v2475_v36 = vpop.f32.mrf.mxu1 }
 0x1ce   :  { %v2499_v10 = vpop.f32.mrf.mxu3 }
 0x1cf   :  { %v2486_v7 = vpop.f32.mrf.mxu2 }
 0x1d0   :  { %v2487_v39 = vadd.f32 %v2486_v7, %v2474_v37 }
 0x1d2   :  { %v2500_v54 = vadd.f32 %v2499_v10, %v2487_v39 }
 0x1d4   :  { %v2609_v40 = vmax.f32 %v2500_v54, 0.0 }
 0x1d6   :  { %v2613_v42 = vpack.c.bf16 %v2609_v40, %v2609_v40  ;;  %v2501_v48 = vpop.f32.mrf.mxu3 }
 0x1d7   :  { %v2488_v43 = vpop.f32.mrf.mxu2 }
 0x1d8   :  { %2909 = vmatmul.bf16.vlgmr.msra.gmra.mxu2 %v2613_v42 }
 0x1e1   :  { %v2512_v50 = vpop.f32.mrf.mxu0 }
 0x1e2   :  { %v2513_v63 = vadd.f32 %v2512_v50, %v906_v62 }
 0x1e4   :  { %v2525_v58 = vpop.f32.mrf.mxu1 }
 0x1e5   :  { %v2526_v0 = vadd.f32 %v2525_v58, %v2513_v63 }
 0x1e9   :  { %v2514_v55 = vpop.f32.mrf.mxu0 }
 0x1ec   :  { %v2527_v56 = vpop.f32.mrf.mxu1 }
 0x1ee   :  { %v2551_v60 = vpop.f32.mrf.mxu3 }
 0x1ef   :  { %v2538_v59 = vpop.f32.mrf.mxu2 }
 0x1f0   :  { %v2539_v2 = vadd.f32 %v2538_v59, %v2526_v0 }
 0x1f2   :  { %v2552_v52 = vadd.f32 %v2551_v60, %v2539_v2 }
 0x1f6   :  { %v2553_v6 = vpop.f32.mrf.mxu3 }
 0x1f7   :  { %v2540_v18 = vpop.f32.mrf.mxu2 }
 0x201   :  { %v2564_v23 = vpop.f32.mrf.mxu0 }
 0x202   :  { %v2565_v8 = vadd.f32 %v2564_v23, %v2552_v52 }
 0x204   :  { %v2577_v5 = vpop.f32.mrf.mxu1 }
 0x205   :  { %v2578_v13 = vadd.f32 %v2577_v5, %v2565_v8 }
 0x209   :  { %v2566_v9 = vpop.f32.mrf.mxu0 }
 0x20c   :  { %v2579_v12 = vpop.f32.mrf.mxu1 }
 0x20e   :  { %v2603_v15 = vpop.f32.mrf.mxu3 }
 0x20f   :  { %v2590_v57 = vpop.f32.mrf.mxu2 }
 0x210   :  { %v2591_v14 = vadd.f32 %v2590_v57, %v2578_v13 }
 0x212   :  { %v2604_v16 = vadd.f32 %v2603_v15, %v2591_v14 }
 0x214   :  { %v2610_v17 = vmax.f32 %v2604_v16, 0.0 }
 0x216   :  { %v2614_v19 = vpack.c.bf16 %v2610_v17, %v2610_v17  ;;  %v2605_v46 = vpop.f32.mrf.mxu3 }
 0x217   :  { %v2592_v20 = vpop.f32.mrf.mxu2 }
 0x218   :  { %2922 = vmatmul.bf16.vlgmr.msra.gmra.mxu3 %v2614_v19 }
 0x221   :  { %v2884_v44 = vpop.f32.mrf.mxu0 }
 0x222   :  { %v2885_v22 = vadd.f32 %v4740_v21, %v2884_v44  ;;  %v2897_v24 = vpop.f32.mrf.mxu1 }
 0x224   :  { %v2898_v3 = vadd.f32 %v2897_v24, %v2885_v22 }
 0x229   :  { %v2886_v25 = vpop.f32.mrf.mxu0 }
 0x22a   :  { %v2899_v26 = vpop.f32.mrf.mxu1 }
 0x25b   :  { %v2910_v51 = vpop.f32.mrf.mxu2 }
 0x25c   :  { %v2911_v28 = vadd.f32 %v2910_v51, %v2898_v3 }
 0x263   :  { %v2912_v27 = vpop.f32.mrf.mxu2 }
 0x29b   :  { %v2923_v4 = vpop.f32.mrf.mxu3 }
 0x29c   :  { %v2924_v29 = vadd.f32 %v2923_v4, %v2911_v28 }
 0x29e   :  { %v2927_v31 = vmax.f32 %v2924_v29, 0.0 }
 0x2a0   :  { %v2932_v32 = vmul.f32 %v4741_v30, %v2927_v31 }
 0x2a2   :  { %2933 = vadd.xlane.f32.xlu0 %v2932_v32 }
 0x2a3   :  { %v2925_v33 = vpop.f32.mrf.mxu3 }
 0x315   :  { %v2934_v35 = vpop.xlane.xlu0 %2933 }
 0x316   :  { %v2937_v11 = vadd.f32 %v2936_v34, %v2934_v35 }
 0x318   :  { %v4375_v36 = vmul.f32 -1.442695, %v2937_v11 }
 0x31a   :  { %4742 = vpow2.f32 %v4375_v36 }
 0x320   :  { %v4743_v37 = vpop.eup %4742 }
 0x321   :  { %v2941_v7 = vadd.f32 1.0, %v4743_v37 }
 0x323   :  { %4744 = vrcp.f32 %v2941_v7  ;;  %v2953_v54 = vand.u32 2147483648, %v2941_v7  ;;  %v2951_v41 = vand.u32 2147483647, %v2941_v7  ;;  %vm2947_vm1 = vweird.f32 %v2941_v7 }
 0x325   :  { %v2954_v43 = vor.u32 1.1754944e-38, %v2953_v54  ;;  %vm2952_vm4 = vcmp.eq.f32.partialorder %v2951_v41, 8.507059e+37 }
 0x329   :  { %v4745_v38 = vpop.eup %4744 }
 0x32a   :  { %v2943_v39 = vmul.f32 %v4745_v38, %v2941_v7  ;;  %vm2948_vm0 = vweird.f32 %v4745_v38 }
 0x32b   :  { %vm2949_vm2 = vmor %vm2947_vm1, %vm2948_vm0 }
 0x32c   :  { %v2944_v10 = vsub.f32 1.0, %v2943_v39 }
 0x32e   :  { %v2945_v40 = vmul.f32 %v4745_v38, %v2944_v10 }
 0x330   :  { %v2946_v42 = vadd.f32 %v4745_v38, %v2945_v40 }
 0x332   :  { %v2950_v47 = vsel %vm2949_vm2, %v4745_v38, %v2946_v42 }
 0x333   :  { %v2955_v48 = vsel %vm2952_vm4, %v2954_v43, %v2950_v47 }
 0x334   :  { %2958 = vst.msk [vmem:[%s5097_s9] sm:$0xff] %vm2957_vm3, %v2955_v48 }
 0x335   :  { %2963 = vsyncpa [#allocation4], 1 }
 0x336   :  { %2964 = vsyncpa [#allocation6], 1 }
 0x337   :  { %2965 = vsyncpa [#allocation9], 1 }
 0x338   :  { %2966 = vsyncpa [#allocation12], 1 }

</bundles_post_ra>
